<compile_context>
chip_gen: v6e
topology: v6e:2x2x1
jax: 0.10.0
libtpu: 0.0.40
codegen_flags: <defaults>
</compile_context>

<pallas_src>
import jax
import jax.numpy as jnp
from jax import lax
from jax.experimental import pallas as pl
from jax.experimental.pallas import tpu as pltpu


# ---------------------------------------------------------------------------
# Fused kernel: encoder + cosine-similarity graph + pooled MLP head
# ---------------------------------------------------------------------------
def fused_kernel(x_ref, wenc_t_ref, benc_col_ref, benc_row_ref,
                 w1_ref, b1_ref, w2_ref, b2_ref, out_ref, sim_ref):
    bt, C, N = x_ref.shape

    w_t = wenc_t_ref[...]                      # [Dh, C]
    b_col = benc_col_ref[...]                  # [Dh, 1]
    # Hoist tiny weight-column slices out of the loop (values, not broadcasts).
    w_cols = [w_t[:, c:c + 1] for c in range(C)] if C <= 8 else None

    def body(bb, carry):
        xb = x_ref[bb]                         # [C, N]  (nodes lane-dense)

        if C <= 8:
            # K=C is far too small to feed the MXU usefully: VPU broadcast-MAC.
            emb_t = b_col + w_cols[0] * xb[0:1, :]
            for c in range(1, C):
                emb_t = emb_t + w_cols[c] * xb[c:c + 1, :]      # [Dh, N]
        else:
            emb_t = jnp.dot(w_t, xb, preferred_element_type=jnp.float32) + b_col

        # cal_similarity_graph: L2-normalize every node (column), Gram matrix.
        # rsqrt goes to the (idle) EUP slot; eps avoids NaN on zero rows.
        inv = lax.rsqrt(
            jnp.sum(emb_t * emb_t, axis=0, keepdims=True) + 1e-12)   # [1, N]
        ne_bf = (emb_t * inv).astype(jnp.bfloat16)                   # [Dh, N]

        # Gram matrix via dim-0 contraction: no materialized transpose, one
        # bf16 cast, f32 accumulation on the MXU.
        sim = lax.dot_general(ne_bf, ne_bf,
                              dimension_numbers=(((0,), (0,)), ((), ())),
                              preferred_element_type=jnp.float32)    # [N, N]
        sim_ref[bb] = sim.astype(sim_ref.dtype)
        return carry

    lax.fori_loop(0, bt, body, 0, unroll=(bt <= 4))

    # global_mean_pool + lin1 -> ReLU -> lin2 head, batched over bt.
    # Pool the raw inputs (encoder is affine => exact).
    xmean = jnp.mean(x_ref[...], axis=2)                             # [bt, C]
    pooled = lax.dot_general(xmean, w_t,
                             dimension_numbers=(((1,), (1,)), ((), ())),
                             preferred_element_type=jnp.float32)
    pooled = pooled + benc_row_ref[...]                              # [bt, Dh]
    h = jnp.maximum(
        jnp.dot(pooled, w1_ref[...], preferred_element_type=jnp.float32)
        + b1_ref[...], 0.0)                                          # ReLU
    out_ref[...] = (
        jnp.dot(h, w2_ref[...], preferred_element_type=jnp.float32)
        + b2_ref[...])                                               # [bt, Dout]


# ---------------------------------------------------------------------------
# Generation-aware tiling heuristics
# ---------------------------------------------------------------------------
def _tpu_vmem_and_cores():
    """Return (physical VMEM bytes per core, has-2-TensorCores) with fallbacks."""
    kind = ""
    try:
        kind = jax.devices()[0].device_kind.lower()
    except Exception:
        pass
    two_tc = any(t in kind for t in ("v7", "v4", "v3", "v5p"))
    vmem_cap = 64 << 20                      # conservative default (v7x per-TC)
    try:
        info = pltpu.get_tpu_info()
        vmem_cap = int(getattr(info, "vmem_capacity_bytes", vmem_cap))
    except Exception:
        if any(t in kind for t in ("v5 lite", "v5e", "v6")):
            vmem_cap = 128 << 20
    return vmem_cap, two_tc


def _pick_bt(B, per_step_bytes, vmem_budget, two_tc):
    """Largest bt that fits VMEM; on 2-TC chips prefer an even number of steps."""
    divisors = [d for d in range(1, B + 1) if B % d == 0]
    fitting = [d for d in divisors if per_step_bytes(d) <= vmem_budget] or [1]
    best = max(fitting)
    if two_tc:
        even = [d for d in fitting if (B // d) % 2 == 0]
        if even:
            best = max(even)
    return best


# ---------------------------------------------------------------------------
# Wrapper
# ---------------------------------------------------------------------------
def att_hgraph_learner_forward(x, params, sim_dtype=jnp.bfloat16):
    """x: [B, C, H, W] float32.  Returns (out [B, Dout], similarity [B, N, N])."""
    B, C, H, W = x.shape
    N = H * W
    w_enc, b_enc, w1, b1, w2, b2 = (
        params["w_enc"], params["b_enc"],
        params["w1"], params["b1"], params["w2"], params["b2"],
    )
    Dh = w_enc.shape[1]
    Dout = w2.shape[1]

    # NCHW -> [B, C, N] is a pure reshape.  Tiny one-time weight/bias reshapes
    # so the kernel consumes them in the layouts it needs (no in-kernel shuffles).
    x_cn = x.reshape(B, C, N)
    w_enc_t = w_enc.T                      # [Dh, C]
    b_col = b_enc.reshape(Dh, 1)           # encoder bias, column layout
    b_row = b_enc.reshape(1, Dh)           # same bias, row layout for pooling

    sim_bytes = jnp.dtype(sim_dtype).itemsize
    vmem_cap, two_tc = _tpu_vmem_and_cores()
    vmem_budget = int(vmem_cap * 0.7)      # headroom for temps/internal scratch

    weight_bytes = 4 * (Dh * C + 2 * Dh + Dh * Dh + Dh + Dh * Dout + Dout)

    def per_step_bytes(bt):
        io = bt * (C * N * 4 + N * N * sim_bytes + Dout * 4)
        temps = N * N * (4 + sim_bytes) + 8 * Dh * N * 4   # live Gram f32 + embs
        return 2 * (io + weight_bytes) + temps             # pipeline double-buffers

    bt = _pick_bt(B, per_step_bytes, vmem_budget, two_tc)
    grid = (B // bt,)
    vmem_limit = min(int(vmem_cap * 0.85),
                     max(per_step_bytes(bt) + (8 << 20), 32 << 20))

    cost = pl.CostEstimate(
        flops=2 * B * N * N * Dh            # similarity Gram matrix
              + 2 * B * N * C * Dh          # node encoder
              + 2 * B * Dh * Dh + 2 * B * Dh * Dout,       # head
        transcendentals=B * N,              # rsqrt per node
        bytes_accessed=(4 * B * C * N + sim_bytes * B * N * N
                        + 4 * B * Dout + weight_bytes),
    )

    out, sim = pl.pallas_call(
        fused_kernel,
        out_shape=(
            jax.ShapeDtypeStruct((B, Dout), jnp.float32),
            jax.ShapeDtypeStruct((B, N, N), sim_dtype),
        ),
        grid_spec=pltpu.PrefetchScalarGridSpec(
            num_scalar_prefetch=0,
            grid=grid,
            in_specs=[
                pl.BlockSpec((bt, C, N), lambda i: (i, 0, 0)),   # x
                pl.BlockSpec((Dh, C), lambda i: (0, 0)),         # W_enc^T
                pl.BlockSpec((Dh, 1), lambda i: (0, 0)),         # b_enc (col)
                pl.BlockSpec((1, Dh), lambda i: (0, 0)),         # b_enc (row)
                pl.BlockSpec((Dh, Dh), lambda i: (0, 0)),        # lin1 W
                pl.BlockSpec((1, Dh), lambda i: (0, 0)),         # lin1 b
                pl.BlockSpec((Dh, Dout), lambda i: (0, 0)),      # lin2 W
                pl.BlockSpec((1, Dout), lambda i: (0, 0)),       # lin2 b
            ],
            out_specs=[
                pl.BlockSpec((bt, Dout), lambda i: (i, 0)),
                pl.BlockSpec((bt, N, N), lambda i: (i, 0, 0)),
            ],
        ),
        compiler_params=pltpu.CompilerParams(
            dimension_semantics=("parallel",),
            vmem_limit_bytes=vmem_limit),
        cost_estimate=cost,
    )(x_cn, w_enc_t, b_col, b_row, w1, b1, w2, b2)

    # TODO(synk): Hypergraph.from_feature_kNN / hypergraph_to_edge_index and the
    # GPSConv/GCNConv stack are undefined in the reference; `sim` is returned
    # as-is (bf16) for the downstream (un-fused) consumer.
    return out, sim


def init_params(key, C, hidden_channels, out_channels):
    # NOTE: weights are stored [in, out]; PyTorch nn.Linear stores [out, in] --
    # transpose when loading real checkpoints.
    k1, k2, k3 = jax.random.split(key, 3)
    scale = 0.1
    return {
        "w_enc": scale * jax.random.normal(k1, (C, hidden_channels), jnp.float32),
        "b_enc": jnp.zeros((1, hidden_channels), jnp.float32),
        "w1": scale * jax.random.normal(k2, (hidden_channels, hidden_channels), jnp.float32),
        "b1": jnp.zeros((1, hidden_channels), jnp.float32),
        "w2": scale * jax.random.normal(k3, (hidden_channels, out_channels), jnp.float32),
        "b2": jnp.zeros((1, out_channels), jnp.float32),
    }


if __name__ == "__main__":
    key = jax.random.PRNGKey(0)
    kx, kp = jax.random.split(key)

    B, C, H, W = 2, 4, 16, 16          # N = 256 nodes per batch element
    hidden_channels, out_channels = 32, 16

    x = jax.random.normal(kx, (B, C, H, W), jnp.float32)
    params = init_params(kp, C, hidden_channels, out_channels)

    out, sim = jax.jit(att_hgraph_learner_forward)(x, params)
    jax.block_until_ready((out, sim))

    assert out.shape == (B, out_channels)
    assert sim.shape == (B, H * W, H * W)
    print("KERNEL_OK")
</pallas_src>

<mosaic_0001>
module attributes {stable_mosaic.version = 11 : i64} {
  func.func @fused_kernel(%arg0: i32, %arg1: memref<2x4x256xf32, #tpu.memory_space<vmem>>, %arg2: memref<32x4xf32, #tpu.memory_space<vmem>>, %arg3: memref<32x1xf32, #tpu.memory_space<vmem>>, %arg4: memref<1x32xf32, #tpu.memory_space<vmem>>, %arg5: memref<32x32xf32, #tpu.memory_space<vmem>>, %arg6: memref<1x32xf32, #tpu.memory_space<vmem>>, %arg7: memref<32x16xf32, #tpu.memory_space<vmem>>, %arg8: memref<1x16xf32, #tpu.memory_space<vmem>>, %arg9: memref<2x16xf32, #tpu.memory_space<vmem>>, %arg10: memref<2x256x256xbf16, #tpu.memory_space<vmem>>) attributes {dimension_semantics = [#tpu.dimension_semantics<parallel>], iteration_bounds = array<i64: 1>, scalar_prefetch = 0 : i64, scratch_operands = 0 : i64, tpu.core_type = #tpu.core_type<tc>, window_params = [{transform_indices = @transform_0, window_bounds = array<i64: 2, 4, 256>}, {pipeline_mode = #tpu.pipeline_mode<synchronous>, transform_indices = @transform_1, window_bounds = array<i64: 32, 4>}, {pipeline_mode = #tpu.pipeline_mode<synchronous>, transform_indices = @transform_2, window_bounds = array<i64: 32, 1>}, {pipeline_mode = #tpu.pipeline_mode<synchronous>, transform_indices = @transform_3, window_bounds = array<i64: 1, 32>}, {pipeline_mode = #tpu.pipeline_mode<synchronous>, transform_indices = @transform_4, window_bounds = array<i64: 32, 32>}, {pipeline_mode = #tpu.pipeline_mode<synchronous>, transform_indices = @transform_5, window_bounds = array<i64: 1, 32>}, {pipeline_mode = #tpu.pipeline_mode<synchronous>, transform_indices = @transform_6, window_bounds = array<i64: 32, 16>}, {pipeline_mode = #tpu.pipeline_mode<synchronous>, transform_indices = @transform_7, window_bounds = array<i64: 1, 16>}, {transform_indices = @transform_8, window_bounds = array<i64: 2, 16>}, {transform_indices = @transform_9, window_bounds = array<i64: 2, 256, 256>}]} {
    %c0 = arith.constant 0 : index
    %c0_0 = arith.constant 0 : index
    %0 = vector.load %arg2[%c0, %c0_0] : memref<32x4xf32, #tpu.memory_space<vmem>>, vector<32x4xf32>
    %c0_1 = arith.constant 0 : index
    %c0_2 = arith.constant 0 : index
    %1 = vector.load %arg3[%c0_1, %c0_2] : memref<32x1xf32, #tpu.memory_space<vmem>>, vector<32x1xf32>
    %2 = vector.extract_strided_slice %0 {offsets = [0, 0], sizes = [32, 1], strides = [1, 1]} : vector<32x4xf32> to vector<32x1xf32>
    %3 = vector.extract_strided_slice %0 {offsets = [0, 1], sizes = [32, 1], strides = [1, 1]} : vector<32x4xf32> to vector<32x1xf32>
    %4 = vector.extract_strided_slice %0 {offsets = [0, 2], sizes = [32, 1], strides = [1, 1]} : vector<32x4xf32> to vector<32x1xf32>
    %5 = vector.extract_strided_slice %0 {offsets = [0, 3], sizes = [32, 1], strides = [1, 1]} : vector<32x4xf32> to vector<32x1xf32>
    %c0_i32 = arith.constant 0 : i32
    %6 = arith.index_cast %c0_i32 : i32 to index
    %c0_3 = arith.constant 0 : index
    %c0_4 = arith.constant 0 : index
    %7 = vector.load %arg1[%6, %c0_3, %c0_4] : memref<2x4x256xf32, #tpu.memory_space<vmem>>, vector<1x4x256xf32>
    %8 = vector.shape_cast %7 : vector<1x4x256xf32> to vector<4x256xf32>
    %9 = vector.extract_strided_slice %8 {offsets = [0, 0], sizes = [1, 256], strides = [1, 1]} : vector<4x256xf32> to vector<1x256xf32>
    %10 = vector.broadcast %2 : vector<32x1xf32> to vector<32x256xf32>
    %11 = vector.broadcast %9 : vector<1x256xf32> to vector<32x256xf32>
    %12 = arith.mulf %10, %11 : vector<32x256xf32>
    %13 = vector.broadcast %1 : vector<32x1xf32> to vector<32x256xf32>
    %14 = arith.addf %13, %12 : vector<32x256xf32>
    %15 = vector.extract_strided_slice %8 {offsets = [1, 0], sizes = [1, 256], strides = [1, 1]} : vector<4x256xf32> to vector<1x256xf32>
    %16 = vector.broadcast %3 : vector<32x1xf32> to vector<32x256xf32>
    %17 = vector.broadcast %15 : vector<1x256xf32> to vector<32x256xf32>
    %18 = arith.mulf %16, %17 : vector<32x256xf32>
    %19 = arith.addf %14, %18 : vector<32x256xf32>
    %20 = vector.extract_strided_slice %8 {offsets = [2, 0], sizes = [1, 256], strides = [1, 1]} : vector<4x256xf32> to vector<1x256xf32>
    %21 = vector.broadcast %4 : vector<32x1xf32> to vector<32x256xf32>
    %22 = vector.broadcast %20 : vector<1x256xf32> to vector<32x256xf32>
    %23 = arith.mulf %21, %22 : vector<32x256xf32>
    %24 = arith.addf %19, %23 : vector<32x256xf32>
    %25 = vector.extract_strided_slice %8 {offsets = [3, 0], sizes = [1, 256], strides = [1, 1]} : vector<4x256xf32> to vector<1x256xf32>
    %26 = vector.broadcast %5 : vector<32x1xf32> to vector<32x256xf32>
    %27 = vector.broadcast %25 : vector<1x256xf32> to vector<32x256xf32>
    %28 = arith.mulf %26, %27 : vector<32x256xf32>
    %29 = arith.addf %24, %28 : vector<32x256xf32>
    %30 = arith.mulf %29, %29 : vector<32x256xf32>
    %cst = arith.constant dense<0.000000e+00> : vector<256xf32>
    %31 = vector.multi_reduction <add>, %30, %cst [0] : vector<32x256xf32> to vector<256xf32>
    %32 = vector.shape_cast %31 : vector<256xf32> to vector<1x256xf32>
    %cst_5 = arith.constant 9.99999996E-13 : f32
    %33 = vector.broadcast %cst_5 : f32 to vector<1x256xf32>
    %34 = arith.addf %32, %33 : vector<1x256xf32>
    %35 = math.rsqrt %34 : vector<1x256xf32>
    %36 = vector.broadcast %35 : vector<1x256xf32> to vector<32x256xf32>
    %37 = arith.mulf %29, %36 : vector<32x256xf32>
    %38 = arith.truncf %37 : vector<32x256xf32> to vector<32x256xbf16>
    %cst_6 = arith.constant dense<0.000000e+00> : vector<256x256xf32>
    %39 = tpu.matmul %38, %38, %cst_6 {dimension_numbers = #tpu.dot_dimension_numbers<[0], [0], [1], [1], [0, 1, 1, 1], [], []>} : vector<32x256xbf16>, vector<32x256xbf16>, vector<256x256xf32> -> vector<256x256xf32>
    %40 = arith.truncf %39 : vector<256x256xf32> to vector<256x256xbf16>
    %41 = arith.index_cast %c0_i32 : i32 to index
    %c0_7 = arith.constant 0 : index
    %c0_8 = arith.constant 0 : index
    %42 = vector.load %arg10[%41, %c0_7, %c0_8] : memref<2x256x256xbf16, #tpu.memory_space<vmem>>, vector<1x256x256xbf16>
    %43 = vector.shape_cast %42 : vector<1x256x256xbf16> to vector<256x256xbf16>
    %44 = vector.shape_cast %40 : vector<256x256xbf16> to vector<1x256x256xbf16>
    tpu.vector_store %arg10[%41, %c0_7, %c0_8], %44 {strides = array<i32>} : memref<2x256x256xbf16, #tpu.memory_space<vmem>>, vector<1x256x256xbf16>,
    %c1_i32 = arith.constant 1 : i32
    %45 = arith.index_cast %c1_i32 : i32 to index
    %c0_9 = arith.constant 0 : index
    %c0_10 = arith.constant 0 : index
    %46 = vector.load %arg1[%45, %c0_9, %c0_10] : memref<2x4x256xf32, #tpu.memory_space<vmem>>, vector<1x4x256xf32>
    %47 = vector.shape_cast %46 : vector<1x4x256xf32> to vector<4x256xf32>
    %48 = vector.extract_strided_slice %47 {offsets = [0, 0], sizes = [1, 256], strides = [1, 1]} : vector<4x256xf32> to vector<1x256xf32>
    %49 = vector.broadcast %2 : vector<32x1xf32> to vector<32x256xf32>
    %50 = vector.broadcast %48 : vector<1x256xf32> to vector<32x256xf32>
    %51 = arith.mulf %49, %50 : vector<32x256xf32>
    %52 = vector.broadcast %1 : vector<32x1xf32> to vector<32x256xf32>
    %53 = arith.addf %52, %51 : vector<32x256xf32>
    %54 = vector.extract_strided_slice %47 {offsets = [1, 0], sizes = [1, 256], strides = [1, 1]} : vector<4x256xf32> to vector<1x256xf32>
    %55 = vector.broadcast %3 : vector<32x1xf32> to vector<32x256xf32>
    %56 = vector.broadcast %54 : vector<1x256xf32> to vector<32x256xf32>
    %57 = arith.mulf %55, %56 : vector<32x256xf32>
    %58 = arith.addf %53, %57 : vector<32x256xf32>
    %59 = vector.extract_strided_slice %47 {offsets = [2, 0], sizes = [1, 256], strides = [1, 1]} : vector<4x256xf32> to vector<1x256xf32>
    %60 = vector.broadcast %4 : vector<32x1xf32> to vector<32x256xf32>
    %61 = vector.broadcast %59 : vector<1x256xf32> to vector<32x256xf32>
    %62 = arith.mulf %60, %61 : vector<32x256xf32>
    %63 = arith.addf %58, %62 : vector<32x256xf32>
    %64 = vector.extract_strided_slice %47 {offsets = [3, 0], sizes = [1, 256], strides = [1, 1]} : vector<4x256xf32> to vector<1x256xf32>
    %65 = vector.broadcast %5 : vector<32x1xf32> to vector<32x256xf32>
    %66 = vector.broadcast %64 : vector<1x256xf32> to vector<32x256xf32>
    %67 = arith.mulf %65, %66 : vector<32x256xf32>
    %68 = arith.addf %63, %67 : vector<32x256xf32>
    %69 = arith.mulf %68, %68 : vector<32x256xf32>
    %cst_11 = arith.constant dense<0.000000e+00> : vector<256xf32>
    %70 = vector.multi_reduction <add>, %69, %cst_11 [0] : vector<32x256xf32> to vector<256xf32>
    %71 = vector.shape_cast %70 : vector<256xf32> to vector<1x256xf32>
    %cst_12 = arith.constant 9.99999996E-13 : f32
    %72 = vector.broadcast %cst_12 : f32 to vector<1x256xf32>
    %73 = arith.addf %71, %72 : vector<1x256xf32>
    %74 = math.rsqrt %73 : vector<1x256xf32>
    %75 = vector.broadcast %74 : vector<1x256xf32> to vector<32x256xf32>
    %76 = arith.mulf %68, %75 : vector<32x256xf32>
    %77 = arith.truncf %76 : vector<32x256xf32> to vector<32x256xbf16>
    %cst_13 = arith.constant dense<0.000000e+00> : vector<256x256xf32>
    %78 = tpu.matmul %77, %77, %cst_13 {dimension_numbers = #tpu.dot_dimension_numbers<[0], [0], [1], [1], [0, 1, 1, 1], [], []>} : vector<32x256xbf16>, vector<32x256xbf16>, vector<256x256xf32> -> vector<256x256xf32>
    %79 = arith.truncf %78 : vector<256x256xf32> to vector<256x256xbf16>
    %80 = arith.index_cast %c1_i32 : i32 to index
    %c0_14 = arith.constant 0 : index
    %c0_15 = arith.constant 0 : index
    %81 = vector.load %arg10[%80, %c0_14, %c0_15] : memref<2x256x256xbf16, #tpu.memory_space<vmem>>, vector<1x256x256xbf16>
    %82 = vector.shape_cast %81 : vector<1x256x256xbf16> to vector<256x256xbf16>
    %83 = vector.shape_cast %79 : vector<256x256xbf16> to vector<1x256x256xbf16>
    tpu.vector_store %arg10[%80, %c0_14, %c0_15], %83 {strides = array<i32>} : memref<2x256x256xbf16, #tpu.memory_space<vmem>>, vector<1x256x256xbf16>,
    %c2_i32 = arith.constant 2 : i32
    %c0_16 = arith.constant 0 : index
    %c0_17 = arith.constant 0 : index
    %c0_18 = arith.constant 0 : index
    %84 = vector.load %arg1[%c0_16, %c0_17, %c0_18] : memref<2x4x256xf32, #tpu.memory_space<vmem>>, vector<2x4x256xf32>
    %cst_19 = arith.constant dense<0.000000e+00> : vector<2x4xf32>
    %85 = vector.multi_reduction <add>, %84, %cst_19 [2] : vector<2x4x256xf32> to vector<2x4xf32>
    %cst_20 = arith.constant 2.560000e+02 : f32
    %86 = vector.broadcast %cst_20 : f32 to vector<2x4xf32>
    %87 = arith.divf %85, %86 : vector<2x4xf32>
    %cst_21 = arith.constant dense<0.000000e+00> : vector<2x32xf32>
    %88 = tpu.matmul %87, %0, %cst_21 {dimension_numbers = #tpu.dot_dimension_numbers<[1], [1], [0], [0], [0, 0, 1, 0], [], []>} : vector<2x4xf32>, vector<32x4xf32>, vector<2x32xf32> -> vector<2x32xf32>
    %c0_22 = arith.constant 0 : index
    %c0_23 = arith.constant 0 : index
    %89 = vector.load %arg4[%c0_22, %c0_23] : memref<1x32xf32, #tpu.memory_space<vmem>>, vector<1x32xf32>
    %90 = vector.broadcast %89 : vector<1x32xf32> to vector<2x32xf32>
    %91 = arith.addf %88, %90 : vector<2x32xf32>
    %c0_24 = arith.constant 0 : index
    %c0_25 = arith.constant 0 : index
    %92 = vector.load %arg5[%c0_24, %c0_25] : memref<32x32xf32, #tpu.memory_space<vmem>>, vector<32x32xf32>
    %cst_26 = arith.constant dense<0.000000e+00> : vector<2x32xf32>
    %93 = tpu.matmul %91, %92, %cst_26 {dimension_numbers = #tpu.dot_dimension_numbers<[1], [0], [0], [1], [0, 0, 1, 1], [], []>} : vector<2x32xf32>, vector<32x32xf32>, vector<2x32xf32> -> vector<2x32xf32>
    %c0_27 = arith.constant 0 : index
    %c0_28 = arith.constant 0 : index
    %94 = vector.load %arg6[%c0_27, %c0_28] : memref<1x32xf32, #tpu.memory_space<vmem>>, vector<1x32xf32>
    %95 = vector.broadcast %94 : vector<1x32xf32> to vector<2x32xf32>
    %96 = arith.addf %93, %95 : vector<2x32xf32>
    %cst_29 = arith.constant 0.000000e+00 : f32
    %97 = vector.broadcast %cst_29 : f32 to vector<2x32xf32>
    %98 = arith.maximumf %96, %97 : vector<2x32xf32>
    %c0_30 = arith.constant 0 : index
    %c0_31 = arith.constant 0 : index
    %99 = vector.load %arg7[%c0_30, %c0_31] : memref<32x16xf32, #tpu.memory_space<vmem>>, vector<32x16xf32>
    %cst_32 = arith.constant dense<0.000000e+00> : vector<2x16xf32>
    %100 = tpu.matmul %98, %99, %cst_32 {dimension_numbers = #tpu.dot_dimension_numbers<[1], [0], [0], [1], [0, 0, 1, 1], [], []>} : vector<2x32xf32>, vector<32x16xf32>, vector<2x16xf32> -> vector<2x16xf32>
    %c0_33 = arith.constant 0 : index
    %c0_34 = arith.constant 0 : index
    %101 = vector.load %arg8[%c0_33, %c0_34] : memref<1x16xf32, #tpu.memory_space<vmem>>, vector<1x16xf32>
    %102 = vector.broadcast %101 : vector<1x16xf32> to vector<2x16xf32>
    %103 = arith.addf %100, %102 : vector<2x16xf32>
    %c0_35 = arith.constant 0 : index
    %c0_36 = arith.constant 0 : index
    %104 = vector.load %arg9[%c0_35, %c0_36] : memref<2x16xf32, #tpu.memory_space<vmem>>, vector<2x16xf32>
    tpu.vector_store %arg9[%c0_35, %c0_36], %103 {strides = array<i32>} : memref<2x16xf32, #tpu.memory_space<vmem>>, vector<2x16xf32>,
    return
  }
  func.func @transform_0(%arg0: i32) -> (i32, i32, i32) {
    %c0_i32 = arith.constant 0 : i32
    %c0_i32_0 = arith.constant 0 : i32
    %c0_i32_1 = arith.constant 0 : i32
    return %arg0, %c0_i32, %c0_i32_0 : i32, i32, i32
  }
  func.func @transform_1(%arg0: i32) -> (i32, i32) {
    %c0_i32 = arith.constant 0 : i32
    %c0_i32_0 = arith.constant 0 : i32
    %c0_i32_1 = arith.constant 0 : i32
    return %c0_i32, %c0_i32_0 : i32, i32
  }
  func.func @transform_2(%arg0: i32) -> (i32, i32) {
    %c0_i32 = arith.constant 0 : i32
    %c0_i32_0 = arith.constant 0 : i32
    %c0_i32_1 = arith.constant 0 : i32
    return %c0_i32, %c0_i32_0 : i32, i32
  }
  func.func @transform_3(%arg0: i32) -> (i32, i32) {
    %c0_i32 = arith.constant 0 : i32
    %c0_i32_0 = arith.constant 0 : i32
    %c0_i32_1 = arith.constant 0 : i32
    return %c0_i32, %c0_i32_0 : i32, i32
  }
  func.func @transform_4(%arg0: i32) -> (i32, i32) {
    %c0_i32 = arith.constant 0 : i32
    %c0_i32_0 = arith.constant 0 : i32
    %c0_i32_1 = arith.constant 0 : i32
    return %c0_i32, %c0_i32_0 : i32, i32
  }
  func.func @transform_5(%arg0: i32) -> (i32, i32) {
    %c0_i32 = arith.constant 0 : i32
    %c0_i32_0 = arith.constant 0 : i32
    %c0_i32_1 = arith.constant 0 : i32
    return %c0_i32, %c0_i32_0 : i32, i32
  }
  func.func @transform_6(%arg0: i32) -> (i32, i32) {
    %c0_i32 = arith.constant 0 : i32
    %c0_i32_0 = arith.constant 0 : i32
    %c0_i32_1 = arith.constant 0 : i32
    return %c0_i32, %c0_i32_0 : i32, i32
  }
  func.func @transform_7(%arg0: i32) -> (i32, i32) {
    %c0_i32 = arith.constant 0 : i32
    %c0_i32_0 = arith.constant 0 : i32
    %c0_i32_1 = arith.constant 0 : i32
    return %c0_i32, %c0_i32_0 : i32, i32
  }
  func.func @transform_8(%arg0: i32) -> (i32, i32) {
    %c0_i32 = arith.constant 0 : i32
    %c0_i32_0 = arith.constant 0 : i32
    return %arg0, %c0_i32 : i32, i32
  }
  func.func @transform_9(%arg0: i32) -> (i32, i32, i32) {
    %c0_i32 = arith.constant 0 : i32
    %c0_i32_0 = arith.constant 0 : i32
    %c0_i32_1 = arith.constant 0 : i32
    return %arg0, %c0_i32, %c0_i32_0 : i32, i32, i32
  }
}

</mosaic_0001>

<bundles_post_ra>
// kernel: att_hgraph_learner_forward.1
= control target key start
LH: loop header
LB: loop body
LE: loop exit
PB: predicated region body
PF: predicated region fallthrough
CT: control target
= control target key end

     0   :  { %15 = vsyncpa [#allocation3], 0  ;;  %v2571_v2 = vmov 0   ;;  %s2560_s0 = inlined_call_operand.vmem [shape: f32[2,4,256], index: 0, kind: input, shape index: {}]   ;;  %s2561_s1 = inlined_call_operand.vmem [shape: f32[32,4], index: 1, kind: input, shape index: {}]   ;;  %s2562_s2 = inlined_call_operand.vmem [shape: f32[32,1], index: 2, kind: input, shape index: {}]   ;;  %s2563_s3 = inlined_call_operand.vmem [shape: f32[1,32], index: 3, kind: input, shape index: {}]   ;;  %s2564_s4 = inlined_call_operand.vmem [shape: f32[32,32], index: 4, kind: input, shape index: {}]   ;;  %s2565_s5 = inlined_call_operand.vmem [shape: f32[1,32], index: 5, kind: input, shape index: {}]   ;;  %s2566_s6 = inlined_call_operand.vmem [shape: f32[32,16], index: 6, kind: input, shape index: {}]   ;;  %s2567_s7 = inlined_call_operand.vmem [shape: f32[1,16], index: 7, kind: input, shape index: {}]   ;;  %s2568_s8 = inlined_call_operand.hbm [shape: f32[2,16], index: 8, kind: output, shape index: {0}]   ;;  %s2569_s9 = inlined_call_operand.hbm [shape: bf16[2,256,256], index: 9, kind: output, shape index: {1}]  }
   0x1   :  { %v2171_v0 = vld [vmem:[%s2561_s1 + $0x10] sm:$0xff]  ;;  %v2176_v1 = vld [vmem:[%s2561_s1] sm:$0xff]  ;;  %2042 = vset.pattern.permute.xlu1 %v2571_v2  ;;  %2041 = vset.pattern.permute.xlu0 %v2571_v2  ;;  %v2188_v4 = vld [vmem:[%s2561_s1 + $0x8] sm:$0xff] }
   0x2   :  { %2580 = vst [vmem:[#allocation8_spill] sm:$0xff] %v2171_v0  ;;  %2581 = vst [vmem:[#allocation9_spill] sm:$0xff] %v2176_v1  ;;  %55 = vperm.xlu1 %2042, %v2171_v0   ;;  %45 = vperm.xlu0 %2041, %v2176_v1   ;;  %v38_v3 = vld [vmem:[%s2562_s2] sm:$0xff] }
   0x3   :  { %2582 = vst [vmem:[#allocation10_spill] sm:$0xff] %v2188_v4  ;;  %423 = vmatprep.mubr.bf16.mxu0 %v2571_v2  ;;  %1101 = vmatprep.mubr.bf16.mxu1 %v2571_v2 }
   0x4   :  { %16 = vsyncpa [#allocation5], 0  ;;  %v39_v5 = vld [vmem:[%s2562_s2 + $0x8] sm:$0xff]  ;;  %v2109_v6 = vmov 1   ;;  %v2200_v7 = vld [vmem:[%s2561_s1 + $0x18] sm:$0xff]  ;;  %v2110_v9 = vmov 2   ;;  %v2570_v12 = vlaneseq }
   0x5   :  { %2583 = vst [vmem:[#allocation11_spill] sm:$0xff] %v2200_v7  ;;  %v40_v8 = vld [vmem:[%s2562_s2 + $0x10] sm:$0xff]  ;;  %v41_v10 = vld [vmem:[%s2562_s2 + $0x18] sm:$0xff]  ;;  %v2111_v11 = vmov 3   ;;  %v2234_v20 = vld [vmem:[%s2560_s0] sm:$0xff]  ;;  %vm1495_vm0 = vcmask 1043456  }
   0x6   :  { %92 = vperm.xlu1 %2042, %v38_v3   ;;  %50 = vperm.xlu0 %2041, %v2188_v4   ;;  %v2225_v15 = vshrl.u32 %v2570_v12, 7  ;;  %2585 = vst [vmem:[#allocation13_spill] sm:$0xff] %v2234_v20  ;;  %v2239_v21 = vld [vmem:[%s2560_s0 + $0x8] sm:$0xff]  ;;  %vm342_vm1 = vcmask 261120   ;;  %vm1530_vm2 = vcmask 31744   ;;  %vm2113_vm3 = vmmov 0  }
   0x7   :  { %vm1528_vm4 = vcmask 1041409   ;;  %s2114_s22 = smov [#allocation4]  }
   0x8   :  { %2584 = vst [vmem:[#allocation12_spill] sm:$0xff] %v2225_v15  ;;  %v66_v18 = vsub.s32 0, %v2225_v15  ;;  %v70_v19 = vsub.s32 4, %v2225_v15  ;;  %v136_v22 = vsub.s32 1, %v2225_v15  ;;  %v140_v23 = vsub.s32 5, %v2225_v15  ;;  %s1797_s1 = sshll.u32 %s2114_s22, 4  ;;  %s1798_s1 = int_to_ptr.vmem [resolvable:$true] %s1797_s1 }
   0x9   :  { %v186_v25 = vsub.s32 2, %v2225_v15  ;;  %v190_v26 = vsub.s32 6, %v2225_v15  ;;  %v236_v28 = vsub.s32 3, %v2225_v15  ;;  %v240_v29 = vsub.s32 7, %v2225_v15  ;;  %s2064_s23 = scalar_lea.vmem %s1798_s1, 8192  ;;  %p2069_p1 = scmp.lt.s32.totalorder %s1798_s1, %s1798_s1 }
   0xa   :  { %2043 = vset.pattern.permute.xlu1 %v2109_v6  ;;  %97 = vperm.xlu0 %2041, %v39_v5   ;;  %v67_v30 = vrot.slane %v2234_v20, %v66_v18  ;;  %v71_v31 = vrot.slane %v2234_v20, %v70_v19  ;;  %v814_v32 = vrot.slane %v2239_v21, %v66_v18  ;;  %p2065_p0 = scmp.ne.s32.totalorder %s1798_s1, %s2064_s23  ;;  %p2070_p2 = scmp.lt.s32.totalorder %s2064_s23, %s2064_s23 }
   0xb   :  { %119 = vperm.xlu1 %2043, %v2176_v1   ;;  %v818_v33 = vrot.slane %v2239_v21, %v70_v19  ;;  %v137_v34 = vrot.slane %v2234_v20, %v136_v22  ;;  %v141_v35 = vrot.slane %v2234_v20, %v140_v23  ;;  %v848_v36 = vrot.slane %v2239_v21, %v136_v22 }
   0xc   :  { %v852_v37 = vrot.slane %v2239_v21, %v140_v23  ;;  %v187_v38 = vrot.slane %v2234_v20, %v186_v25  ;;  %v191_v39 = vrot.slane %v2234_v20, %v190_v26  ;;  %v882_v40 = vrot.slane %v2239_v21, %v186_v25  ;;  %p2071_p3 = por %p2070_p2, %p2069_p1 }
   0xd   :  { %v886_v41 = vrot.slane %v2239_v21, %v190_v26  ;;  %v237_v43 = vrot.slane %v2234_v20, %v236_v28  ;;  %v241_v44 = vrot.slane %v2234_v20, %v240_v29  ;;  %v916_v45 = vrot.slane %v2239_v21, %v236_v28 }
   0xe   :  { %2044 = vset.pattern.permute.xlu0 %v2109_v6  ;;  %v920_v46 = vrot.slane %v2239_v21, %v240_v29  ;;  %v77_v47 = vrot.slane %v67_v30, %v66_v18  ;;  %v81_v48 = vrot.slane %v71_v31, %v66_v18  ;;  %v824_v49 = vrot.slane %v814_v32, %v66_v18  ;;  %p2072_p4 = pnand %p2071_p3, %p2065_p0 }
   0xf   :  { %2045 = vset.pattern.permute.xlu1 %v2571_v2  ;;  %123 = vperm.xlu0 %2044, %v2188_v4   ;;  %v828_v50 = vrot.slane %v818_v33, %v66_v18  ;;  %v2265_v52 = vrot.slane %v137_v34, %v136_v22  ;;  %v2267_v53 = vrot.slane %v141_v35, %v136_v22 }
  0x10   :  { %60 = vperm.xlu1 %2045, %v2200_v7   ;;  %v2269_v54 = vrot.slane %v848_v36, %v136_v22  ;;  %v2271_v55 = vrot.slane %v852_v37, %v136_v22  ;;  %v2273_v56 = vrot.slane %v187_v38, %v186_v25  ;;  %v2275_v57 = vrot.slane %v191_v39, %v186_v25 }
  0x11   :  { %v2277_v58 = vrot.slane %v882_v40, %v186_v25  ;;  %v2279_v59 = vrot.slane %v886_v41, %v186_v25  ;;  %v2281_v61 = vrot.slane %v237_v43, %v236_v28  ;;  %v2283_v62 = vrot.slane %v241_v44, %v236_v28 }
  0x12   :  { %v2285_v63 = vrot.slane %v916_v45, %v236_v28  ;;  %v2287_v3 = vrot.slane %v920_v46, %v236_v28 }
  0x13   :  { %127 = vperm.xlu0 %2044, %v2171_v0  }
  0x14   :  { %102 = vperm.xlu1 %2045, %v40_v8  }
  0x17   :  { %2047 = vset.pattern.permute.xlu0 %v2110_v9 }
  0x18   :  { %2046 = vset.pattern.permute.xlu1 %v2110_v9  ;;  %173 = vperm.xlu0 %2047, %v2188_v4  }
  0x19   :  { %169 = vperm.xlu1 %2046, %v2176_v1  }
  0x1c   :  { %177 = vperm.xlu0 %2047, %v2171_v0  }
  0x1d   :  { %2048 = vset.pattern.permute.xlu1 %v2571_v2 }
  0x1e   :  { %107 = vperm.xlu1 %2048, %v41_v10  }
  0x20   :  { %2051 = vset.pattern.permute.xlu0 %v2111_v11 }
  0x21   :  { %223 = vperm.xlu0 %2051, %v2188_v4  }
  0x22   :  { %2049 = vset.pattern.permute.xlu1 %v2109_v6 }
  0x23   :  { %131 = vperm.xlu1 %2049, %v2200_v7  }
  0x25   :  { %231 = vperm.xlu0 %2051, %v2200_v7  }
  0x27   :  { %2050 = vset.pattern.permute.xlu1 %v2111_v11 }
  0x28   :  { %219 = vperm.xlu1 %2050, %v2176_v1  }
  0x2c   :  { %2052 = vset.pattern.permute.xlu1 %v2110_v9 }
  0x2d   :  { %181 = vperm.xlu1 %2052, %v2200_v7  }
  0x31   :  { %2053 = vset.pattern.permute.xlu1 %v2111_v11 }
  0x32   :  { %227 = vperm.xlu1 %2053, %v2171_v0  }
  0x7d   :  { %v2222_v13 = vpop.permute.xlu1 %55  ;;  %v46_v14 = vpop.permute.xlu0 %45 }
  0x7e   :  { %v82_v5 = vmul.f32 %v77_v47, %v46_v14  ;;  %v83_v6 = vmul.f32 %v81_v48, %v46_v14  ;;  %v829_v8 = vmul.f32 %v824_v49, %v46_v14  ;;  %v830_v9 = vmul.f32 %v828_v50, %v46_v14 }
  0x7f   :  { %v86_v11 = vmul.f32 %v77_v47, %v2222_v13  ;;  %v87_v28 = vmul.f32 %v81_v48, %v2222_v13  ;;  %v833_v30 = vmul.f32 %v824_v49, %v2222_v13  ;;  %v834_v31 = vmul.f32 %v828_v50, %v2222_v13 }
  0x81   :  { %v2227_v16 = vpop.permute.xlu1 %92  ;;  %v51_v17 = vpop.permute.xlu0 %50 }
  0x82   :  { %v84_v18 = vmul.f32 %v77_v47, %v51_v17  ;;  %v85_v19 = vmul.f32 %v81_v48, %v51_v17  ;;  %v831_v22 = vmul.f32 %v824_v49, %v51_v17  ;;  %v832_v23 = vmul.f32 %v828_v50, %v51_v17 }
  0x83   :  { %v110_v32 = vadd.f32 %v2227_v16, %v82_v5  ;;  %v111_v33 = vadd.f32 %v2227_v16, %v83_v6  ;;  %v837_v17 = vadd.f32 %v829_v8, %v2227_v16  ;;  %v838_v34 = vadd.f32 %v830_v9, %v2227_v16 }
  0x85   :  { %v2243_v24 = vpop.permute.xlu0 %97 }
  0x86   :  { %v120_v27 = vpop.permute.xlu1 %119  ;;  %v112_v36 = vadd.f32 %v2243_v24, %v84_v18  ;;  %v113_v37 = vadd.f32 %v2243_v24, %v85_v19  ;;  %v839_v38 = vadd.f32 %v831_v22, %v2243_v24  ;;  %v840_v43 = vadd.f32 %v832_v23, %v2243_v24 }
  0x87   :  { %v152_v25 = vmul.f32 %v2265_v52, %v120_v27  ;;  %v153_v26 = vmul.f32 %v2267_v53, %v120_v27  ;;  %v863_v29 = vmul.f32 %v2269_v54, %v120_v27  ;;  %v864_v14 = vmul.f32 %v2271_v55, %v120_v27 }
  0x89   :  { %v160_v40 = vadd.f32 %v152_v25, %v110_v32  ;;  %v161_v27 = vadd.f32 %v153_v26, %v111_v33  ;;  %v871_v41 = vadd.f32 %v863_v29, %v837_v17  ;;  %v872_v44 = vadd.f32 %v864_v14, %v838_v34 }
  0x8a   :  { %v124_v42 = vpop.permute.xlu0 %123 }
  0x8b   :  { %v61_v51 = vpop.permute.xlu1 %60  ;;  %v154_v39 = vmul.f32 %v2265_v52, %v124_v42  ;;  %v155_v45 = vmul.f32 %v2267_v53, %v124_v42  ;;  %v865_v16 = vmul.f32 %v2269_v54, %v124_v42  ;;  %v866_v46 = vmul.f32 %v2271_v55, %v124_v42 }
  0x8c   :  { %v88_v5 = vmul.f32 %v77_v47, %v61_v51  ;;  %v89_v6 = vmul.f32 %v81_v48, %v61_v51  ;;  %v835_v8 = vmul.f32 %v824_v49, %v61_v51  ;;  %v836_v9 = vmul.f32 %v828_v50, %v61_v51 }
  0x8d   :  { %v162_v18 = vadd.f32 %v154_v39, %v112_v36 }
  0x8e   :  { %v128_v60 = vpop.permute.xlu0 %127 }
  0x8f   :  { %v103_v10 = vpop.permute.xlu1 %102  ;;  %v156_v19 = vmul.f32 %v2265_v52, %v128_v60  ;;  %v157_v22 = vmul.f32 %v2267_v53, %v128_v60  ;;  %v867_v25 = vmul.f32 %v2269_v54, %v128_v60  ;;  %v868_v29 = vmul.f32 %v2271_v55, %v128_v60 }
  0x90   :  { %v114_v26 = vadd.f32 %v103_v10, %v86_v11  ;;  %v115_v24 = vadd.f32 %v103_v10, %v87_v28  ;;  %v841_v23 = vadd.f32 %v833_v30, %v103_v10  ;;  %v842_v33 = vadd.f32 %v834_v31, %v103_v10 }
  0x91   :  { %v163_v28 = vadd.f32 %v155_v45, %v113_v37  ;;  %v873_v30 = vadd.f32 %v865_v16, %v839_v38  ;;  %v874_v60 = vadd.f32 %v866_v46, %v840_v43 }
  0x92   :  { %v164_v10 = vadd.f32 %v156_v19, %v114_v26  ;;  %v165_v31 = vadd.f32 %v157_v22, %v115_v24  ;;  %v875_v34 = vadd.f32 %v867_v25, %v841_v23  ;;  %v876_v39 = vadd.f32 %v868_v29, %v842_v33 }
  0x93   :  { %v174_v35 = vpop.permute.xlu0 %173 }
  0x94   :  { %v170_v13 = vpop.permute.xlu1 %169  ;;  %v204_v42 = vmul.f32 %v2273_v56, %v174_v35  ;;  %v205_v47 = vmul.f32 %v2275_v57, %v174_v35  ;;  %v899_v48 = vmul.f32 %v2277_v58, %v174_v35  ;;  %v900_v49 = vmul.f32 %v2279_v59, %v174_v35 }
  0x95   :  { %v202_v50 = vmul.f32 %v2273_v56, %v170_v13  ;;  %v203_v51 = vmul.f32 %v2275_v57, %v170_v13  ;;  %v897_v11 = vmul.f32 %v2277_v58, %v170_v13  ;;  %v898_v17 = vmul.f32 %v2279_v59, %v170_v13 }
  0x96   :  { %v212_v12 = vadd.f32 %v204_v42, %v162_v18  ;;  %v213_v2 = vadd.f32 %v205_v47, %v163_v28  ;;  %v907_v35 = vadd.f32 %v899_v48, %v873_v30  ;;  %v908_v1 = vadd.f32 %v900_v49, %v874_v60 }
  0x97   :  { %v178_v14 = vpop.permute.xlu0 %177  ;;  %v210_v4 = vadd.f32 %v202_v50, %v160_v40  ;;  %v211_v0 = vadd.f32 %v203_v51, %v161_v27  ;;  %v905_v7 = vadd.f32 %v897_v11, %v871_v41  ;;  %v906_v37 = vadd.f32 %v898_v17, %v872_v44 }
  0x98   :  { %v206_v36 = vmul.f32 %v2273_v56, %v178_v14  ;;  %v207_v38 = vmul.f32 %v2275_v57, %v178_v14  ;;  %v901_v13 = vmul.f32 %v2277_v58, %v178_v14  ;;  %v902_v43 = vmul.f32 %v2279_v59, %v178_v14 }
  0x99   :  { %v108_v32 = vpop.permute.xlu1 %107 }
  0x9a   :  { %v2325_v45 = vadd.f32 %v206_v36, %v164_v10  ;;  %v116_v16 = vadd.f32 %v108_v32, %v88_v5  ;;  %v117_v46 = vadd.f32 %v108_v32, %v89_v6  ;;  %v843_v18 = vadd.f32 %v835_v8, %v108_v32 }
  0x9b   :  { %v844_v29 = vadd.f32 %v836_v9, %v108_v32  ;;  %v215_v14 = vadd.f32 %v207_v38, %v165_v31  ;;  %v909_v33 = vadd.f32 %v901_v13, %v875_v34 }
  0x9c   :  { %v224_v20 = vpop.permute.xlu0 %223 }
  0x9d   :  { %v254_v19 = vmul.f32 %v2281_v61, %v224_v20  ;;  %v255_v22 = vmul.f32 %v2283_v62, %v224_v20  ;;  %v933_v40 = vmul.f32 %v2285_v63, %v224_v20  ;;  %v934_v27 = vmul.f32 %v2287_v3, %v224_v20 }
  0x9e   :  { %v132_v15 = vpop.permute.xlu1 %131  ;;  %v910_v20 = vadd.f32 %v902_v43, %v876_v39 }
  0x9f   :  { %v158_v41 = vmul.f32 %v2265_v52, %v132_v15  ;;  %v159_v44 = vmul.f32 %v2267_v53, %v132_v15  ;;  %v869_v25 = vmul.f32 %v2269_v54, %v132_v15  ;;  %v870_v26 = vmul.f32 %v2271_v55, %v132_v15 }
  0xa0   :  { %v2339_v52 = vadd.f32 %v254_v19, %v212_v12  ;;  %v2341_v53 = vadd.f32 %v255_v22, %v213_v2  ;;  %v2343_v54 = vadd.f32 %v933_v40, %v907_v35  ;;  %v2345_v15 = vadd.f32 %v934_v27, %v908_v1  ;;  %v232_v49 = vpop.permute.xlu0 %231 }
  0xa1   :  { %v166_v55 = vadd.f32 %v158_v41, %v116_v16  ;;  %v167_v42 = vadd.f32 %v159_v44, %v117_v46  ;;  %v877_v47 = vadd.f32 %v869_v25, %v843_v18  ;;  %v878_v48 = vadd.f32 %v870_v26, %v844_v29 }
  0xa2   :  { %v258_v30 = vmul.f32 %v2281_v61, %v232_v49 }
  0xa3   :  { %v220_v24 = vpop.permute.xlu1 %219 }
  0xa4   :  { %v252_v5 = vmul.f32 %v2281_v61, %v220_v24  ;;  %v253_v6 = vmul.f32 %v2283_v62, %v220_v24  ;;  %v931_v8 = vmul.f32 %v2285_v63, %v220_v24  ;;  %v932_v23 = vmul.f32 %v2287_v3, %v220_v24 }
  0xa6   :  { %v2347_v50 = vadd.f32 %v252_v5, %v210_v4  ;;  %v2349_v51 = vadd.f32 %v253_v6, %v211_v0  ;;  %v2351_v9 = vadd.f32 %v931_v8, %v905_v7  ;;  %v2353_v32 = vadd.f32 %v932_v23, %v906_v37 }
  0xa7   :  { %v259_v4 = vmul.f32 %v2283_v62, %v232_v49  ;;  %v937_v0 = vmul.f32 %v2285_v63, %v232_v49  ;;  %v938_v7 = vmul.f32 %v2287_v3, %v232_v49 }
  0xa8   :  { %v182_v12 = vpop.permute.xlu1 %181  ;;  %v268_v34 = vmul.f32 %v2347_v50, %v2347_v50  ;;  %v269_v36 = vmul.f32 %v2349_v51, %v2349_v51  ;;  %v947_v39 = vmul.f32 %v2351_v9, %v2351_v9  ;;  %v948_v35 = vmul.f32 %v2353_v32, %v2353_v32 }
  0xa9   :  { %v208_v2 = vmul.f32 %v2273_v56, %v182_v12  ;;  %v209_v11 = vmul.f32 %v2275_v57, %v182_v12  ;;  %v903_v1 = vmul.f32 %v2277_v58, %v182_v12  ;;  %v904_v28 = vmul.f32 %v2279_v59, %v182_v12 }
  0xaa   :  { %v270_v56 = vmul.f32 %v2339_v52, %v2339_v52  ;;  %v271_v57 = vmul.f32 %v2341_v53, %v2341_v53  ;;  %v949_v58 = vmul.f32 %v2343_v54, %v2343_v54  ;;  %v950_v59 = vmul.f32 %v2345_v15, %v2345_v15 }
  0xab   :  { %v216_v60 = vadd.f32 %v208_v2, %v166_v55  ;;  %v217_v17 = vadd.f32 %v209_v11, %v167_v42  ;;  %v912_v10 = vadd.f32 %v904_v28, %v878_v48  ;;  %v911_v31 = vadd.f32 %v903_v1, %v877_v47 }
  0xac   :  { %v285_v44 = vadd.f32 %v271_v57, %v269_v36  ;;  %v955_v25 = vadd.f32 %v949_v58, %v947_v39 }
  0xad   :  { %v228_v37 = vpop.permute.xlu1 %227  ;;  %v2383_v46 = vadd.f32 %v258_v30, %v216_v60  ;;  %v2385_v18 = vadd.f32 %v259_v4, %v217_v17  ;;  %v2387_v19 = vadd.f32 %v938_v7, %v912_v10  ;;  %v2389_v22 = vadd.f32 %v937_v0, %v911_v31 }
  0xae   :  { %v256_v38 = vmul.f32 %v2281_v61, %v228_v37  ;;  %v257_v13 = vmul.f32 %v2283_v62, %v228_v37  ;;  %v935_v43 = vmul.f32 %v2285_v63, %v228_v37  ;;  %v936_v16 = vmul.f32 %v2287_v3, %v228_v37 }
  0xaf   :  { %v276_v62 = vadd.f32 %v270_v56, %v268_v34  ;;  %v964_v63 = vadd.f32 %v950_v59, %v948_v35  ;;  %v275_v6 = vmul.f32 %v2385_v18, %v2385_v18  ;;  %v954_v8 = vmul.f32 %v2387_v19, %v2387_v19 }
  0xb0   :  { %v264_v40 = vadd.f32 %v256_v38, %v2325_v45  ;;  %v265_v27 = vadd.f32 %v257_v13, %v215_v14  ;;  %v2392_v41 = vadd.f32 %v936_v16, %v910_v20  ;;  %v2394_v61 = vadd.f32 %v935_v43, %v909_v33 }
  0xb1   :  { %v274_v45 = vmul.f32 %v2383_v46, %v2383_v46  ;;  %v953_v23 = vmul.f32 %v2389_v22, %v2389_v22 }
  0xb2   :  { %v272_v3 = vmul.f32 %v264_v40, %v264_v40  ;;  %v273_v26 = vmul.f32 %v265_v27, %v265_v27  ;;  %v952_v24 = vmul.f32 %v2392_v41, %v2392_v41  ;;  %v951_v5 = vmul.f32 %v2394_v61, %v2394_v61 }
  0xb4   :  { %v277_v29 = vadd.f32 %v276_v62, %v272_v3  ;;  %v286_v14 = vadd.f32 %v285_v44, %v273_v26  ;;  %v965_v20 = vadd.f32 %v964_v63, %v952_v24  ;;  %v956_v33 = vadd.f32 %v955_v25, %v951_v5 }
  0xb6   :  { %v278_v55 = vadd.f32 %v277_v29, %v274_v45  ;;  %v287_v42 = vadd.f32 %v286_v14, %v275_v6  ;;  %v966_v47 = vadd.f32 %v965_v20, %v954_v8  ;;  %v957_v48 = vadd.f32 %v956_v33, %v953_v23 }
  0xb8   :  { %v279_v49 = vrot.slane %v278_v55, 4  ;;  %v288_v12 = vrot.slane %v287_v42, 4  ;;  %v967_v2 = vrot.slane %v966_v47, 4  ;;  %v958_v11 = vrot.slane %v957_v48, 4 }
  0xba   :  { %v280_v1 = vadd.f32 %v279_v49, %v278_v55  ;;  %v289_v28 = vadd.f32 %v288_v12, %v287_v42  ;;  %v968_v30 = vadd.f32 %v967_v2, %v966_v47  ;;  %v959_v4 = vadd.f32 %v958_v11, %v957_v48 }
  0xbc   :  { %v281_v0 = vrot.slane %v280_v1, 2  ;;  %v290_v7 = vrot.slane %v289_v28, 2  ;;  %v969_v60 = vrot.slane %v968_v30, 2  ;;  %v960_v17 = vrot.slane %v959_v4, 2 }
  0xbe   :  { %v282_v10 = vadd.f32 %v281_v0, %v280_v1  ;;  %v291_v31 = vadd.f32 %v290_v7, %v289_v28  ;;  %v970_v56 = vadd.f32 %v969_v60, %v968_v30  ;;  %v961_v57 = vadd.f32 %v960_v17, %v959_v4  ;;  %v2587_v1 = vld [vmem:[#allocation11_spill] sm:$0xff]  ;;  %v2589_v30 = vld [vmem:[#allocation8_spill] sm:$0xff]  ;;  %v2590_v4 = vld [vmem:[#allocation10_spill] sm:$0xff] }
  0xbf   :  { %v2591_v7 = vld [vmem:[#allocation9_spill] sm:$0xff] }
  0xc0   :  { %v283_v58 = vrot.slane %v282_v10, 1  ;;  %v292_v59 = vrot.slane %v291_v31, 1  ;;  %v971_v34 = vrot.slane %v970_v56, 1  ;;  %v962_v36 = vrot.slane %v961_v57, 1 }
  0xc2   :  { %v284_v39 = vadd.f32 %v283_v58, %v282_v10  ;;  %v293_v35 = vadd.f32 %v292_v59, %v291_v31  ;;  %v972_v37 = vadd.f32 %v971_v34, %v970_v56  ;;  %v963_v38 = vadd.f32 %v962_v36, %v961_v57 }
  0xc4   :  { %v294_v13 = vadd.f32 1e-12, %v284_v39  ;;  %v295_v43 = vadd.f32 1e-12, %v293_v35  ;;  %v974_v16 = vadd.f32 1e-12, %v972_v37 }
  0xc5   :  { %v973_v62 = vadd.f32 1e-12, %v963_v38 }
  0xc6   :  { %2056 = vrsqrt.f32 %v294_v13  ;;  %v1614_v13 = vld [vmem:[%s2564_s4 + $0x18] sm:$0xff] }
  0xc7   :  { %2058 = vrsqrt.f32 %v295_v43 }
  0xc8   :  { %2060 = vrsqrt.f32 %v974_v16 }
  0xc9   :  { %2062 = vrsqrt.f32 %v973_v62 }
  0xd3   :  { %v2057_v44 = vpop.eup %2056 }
  0xd4   :  { %v2059_v63 = vpop.eup %2058  ;;  %v298_v25 = vmul.f32 %v2057_v44, %v2347_v50  ;;  %v300_v3 = vmul.f32 %v2057_v44, %v2339_v52  ;;  %v302_v26 = vmul.f32 %v2057_v44, %v264_v40  ;;  %v304_v24 = vmul.f32 %v2057_v44, %v2383_v46  ;;  %v1613_v44 = vld [vmem:[%s2564_s4 + $0x10] sm:$0xff] }
  0xd5   :  { %v2061_v5 = vpop.eup %2060  ;;  %v303_v45 = vmul.f32 %v2059_v63, %v265_v27  ;;  %v305_v6 = vmul.f32 %v2059_v63, %v2385_v18  ;;  %v299_v8 = vmul.f32 %v2059_v63, %v2349_v51  ;;  %v301_v23 = vmul.f32 %v2059_v63, %v2341_v53 }
  0xd6   :  { %v2063_v29 = vpop.eup %2062  ;;  %v982_v14 = vmul.f32 %v2061_v5, %v2392_v41  ;;  %v984_v20 = vmul.f32 %v2061_v5, %v2387_v19  ;;  %v306_v33 = vpack.c.bf16 %v300_v3, %v298_v25  ;;  %v308_v50 = vpack.c.bf16 %v304_v24, %v302_v26 }
  0xd7   :  { %v309_v55 = vpack.c.bf16 %v305_v6, %v303_v45  ;;  %v307_v52 = vpack.c.bf16 %v301_v23, %v299_v8  ;;  %v981_v40 = vmul.f32 %v2063_v29, %v2394_v61  ;;  %v983_v46 = vmul.f32 %v2063_v29, %v2389_v22 }
  0xd8   :  { %v988_v27 = vpack.c.bf16 %v984_v20, %v982_v14  ;;  %310 = vxpose.xlu1.c.b16.start [1/2] (short) %v306_v33, 128  ;;  %v978_v18 = vmul.f32 %v2061_v5, %v2353_v32  ;;  %v980_v51 = vmul.f32 %v2061_v5, %v2345_v15  ;;  %v977_v41 = vmul.f32 %v2063_v29, %v2351_v9  ;;  %v2593_v5 = vld [vmem:[#allocation12_spill] sm:$0xff] }
  0xd9   :  { %403 = vmatprep.subr.bf16.mxu0 %v309_v55  ;;  %326 = vxpose.xlu0.c.b16.start [1/2] (short) %v307_v52, 128  ;;  %v987_v53 = vpack.c.bf16 %v983_v46, %v981_v40  ;;  %v979_v19 = vmul.f32 %v2063_v29, %v2343_v54  ;;  %v2112_v32 = vmov 0.0   ;;  %v1492_v15 = vcombine.high %v2239_v21, %v2239_v21  ;;  %v2586_v54 = vld [vmem:[#allocation13_spill] sm:$0xff] }
  0xda   :  { %1081 = vmatprep.subr.bf16.mxu1 %v988_v27  ;;  %404 = vmatpush1.bf16.msra.mxu0 %v308_v50  ;;  %v986_v42 = vpack.c.bf16 %v980_v51, %v978_v18  ;;  %v1491_v9 = vcombine.high %v2586_v54, %v2586_v54  ;;  %v1501_v61 = vsel %vm1495_vm0, %v2239_v21, 0.0  ;;  %v1496_v48 = vsel %vm1495_vm0, %v2586_v54, 0.0 }
  0xdb   :  { %1082 = vmatpush1.bf16.msra.mxu1 %v987_v53  ;;  %405 = vmatprep.subr.bf16.mxu0 %v307_v52  ;;  %v985_v22 = vpack.c.bf16 %v979_v19, %v977_v41  ;;  %v1502_v47 = vsel %vm1495_vm0, %v1492_v15, 0.0  ;;  %v2588_v21 = vmov 0   ;;  %v2592_v25 = vlaneseq }
  0xdc   :  { %1083 = vmatprep.subr.bf16.mxu1 %v986_v42  ;;  %311 = vxpose.xlu1.c.b16.end [2/2] (short) %v308_v50, 128  ;;  %v1497_v49 = vsel %vm1495_vm0, %v1491_v9, 0.0  ;;  %v1503_v12 = vadd.f32 %v1502_v47, %v1501_v61  ;;  %v1612_v50 = vld [vmem:[%s2564_s4 + $0x8] sm:$0xff] }
  0xdd   :  { %327 = vxpose.xlu0.c.b16.end [2/2] (short) %v309_v55, 128  ;;  %v1498_v2 = vadd.f32 %v1497_v49, %v1496_v48  ;;  %v1519_v3 = vand.u32 127, %v2592_v25 }
  0xde   :  { %406 = vmatpush1.bf16.msra.mxu0 %v306_v33 }
  0xdf   :  { %1084 = vmatpush1.bf16.msra.mxu1 %v985_v22  ;;  %1998 = vmatprep.subr.mxu0 %v2112_v32  ;;  %v1522_v45 = vsub.s32 %v1519_v3, %v2593_v5 }
  0xe0   :  { %2009 = vmatprep.subr.mxu1 %v2112_v32 }
 0x101   :  { %1504 = vadd.xlane.f32.xlu1 %v1503_v12 }
 0x102   :  { %1499 = vadd.xlane.f32.xlu0 %v1498_v2 }
 0x12e   :  { %1005 = vxpose.xlu1.c.b16.start [1/2] (short) %v986_v42, 128 }
 0x12f   :  { %989 = vxpose.xlu0.c.b16.start [1/2] (short) %v985_v22, 128 }
 0x132   :  { %1006 = vxpose.xlu1.c.b16.end [2/2] (short) %v988_v27, 128  ;;  %v1611_v27 = vld [vmem:[%s2564_s4] sm:$0xff] }
 0x133   :  { %990 = vxpose.xlu0.c.b16.end [2/2] (short) %v987_v53, 128 }
 0x13a   :  { %v318_v11 = vpop.trf.xlu1 }
 0x13b   :  { %1812 = vmatmul.mubr.msk.bf16.vlgmr.msra.gmra.mxu0 %vm342_vm1, %v318_v11  ;;  %v334_v56 = vpop.trf.xlu0 }
 0x13c   :  { %1999 = vmatpush3.xpose.msk.msra.mxu0 %vm1530_vm2, %v2587_v1  ;;  %433 = vmatprep.mubr.bf16.mxu0 %v2588_v21 }
 0x13d   :  { %2000 = vmatprep.subr.mxu0 %v2112_v32 }
 0x13e   :  { %v319_v28 = vpop.trf.xlu1 }
 0x13f   :  { %v335_v57 = vpop.trf.xlu0 }
 0x140   :  { %2001 = vmatpush3.xpose.msk.msra.mxu0 %vm1530_vm2, %v2589_v30 }
 0x141   :  { %2002 = vmatprep.subr.mxu0 %v2112_v32 }
 0x142   :  { %v320_v0 = vpop.trf.xlu1 }
 0x143   :  { %1813 = vmatmul.mubr.msk.bf16.gmra.mxu0 %vm342_vm1, %v319_v28  ;;  %v336_v59 = vpop.trf.xlu0 }
 0x144   :  { %443 = vmatprep.mubr.bf16.mxu0 %v2588_v21  ;;  %2003 = vmatpush3.xpose.msk.msra.mxu0 %vm1530_vm2, %v2590_v4 }
 0x145   :  { %2004 = vmatprep.subr.mxu0 %v2112_v32 }
 0x146   :  { %v321_v60 = vpop.trf.xlu1 }
 0x147   :  { %v337_v34 = vpop.trf.xlu0 }
 0x148   :  { %2005 = vmatpush3.xpose.msk.msra.mxu0 %vm1530_vm2, %v2591_v7 }
 0x149   :  { %2020 = vmatprep.subr.mxu0 %v2112_v32 }
 0x14a   :  { %v322_v17 = vpop.trf.xlu1 }
 0x14b   :  { %1814 = vmatmul.mubr.msk.bf16.gmra.mxu0 %vm342_vm1, %v320_v0  ;;  %v338_v36 = vpop.trf.xlu0 }
 0x14c   :  { %453 = vmatprep.mubr.bf16.mxu0 %v2588_v21 }
 0x14e   :  { %v323_v10 = vpop.trf.xlu1 }
 0x14f   :  { %v339_v39 = vpop.trf.xlu0 }
 0x152   :  { %v324_v31 = vpop.trf.xlu1 }
 0x153   :  { %1815 = vmatmul.mubr.msk.bf16.gmra.mxu0 %vm342_vm1, %v321_v60  ;;  %v340_v35 = vpop.trf.xlu0 }
 0x154   :  { %463 = vmatprep.mubr.bf16.mxu0 %v2588_v21 }
 0x156   :  { %v325_v58 = vpop.trf.xlu1 }
 0x157   :  { %v341_v37 = vpop.trf.xlu0 }
 0x15b   :  { %1816 = vmatmul.mubr.msk.bf16.gmra.mxu0 %vm342_vm1, %v322_v17 }
 0x15c   :  { %473 = vmatprep.mubr.bf16.mxu0 %v2588_v21 }
 0x163   :  { %1817 = vmatmul.mubr.msk.bf16.gmra.mxu0 %vm342_vm1, %v323_v10 }
 0x164   :  { %483 = vmatprep.mubr.bf16.mxu0 %v2588_v21 }
 0x16b   :  { %1818 = vmatmul.mubr.msk.bf16.gmra.mxu0 %vm342_vm1, %v324_v31 }
 0x16c   :  { %493 = vmatprep.mubr.bf16.mxu0 %v2588_v21 }
 0x173   :  { %1819 = vmatmul.mubr.msk.bf16.gmra.mxu0 %vm342_vm1, %v325_v58 }
 0x174   :  { %503 = vmatprep.mubr.bf16.mxu0 %v2588_v21 }
 0x17b   :  { %1820 = vmatmul.mubr.msk.bf16.gmra.mxu0 %vm342_vm1, %v334_v56 }
 0x17c   :  { %513 = vmatprep.mubr.bf16.mxu0 %v2588_v21 }
 0x183   :  { %1821 = vmatmul.mubr.msk.bf16.gmra.mxu0 %vm342_vm1, %v335_v57 }
 0x184   :  { %523 = vmatprep.mubr.bf16.mxu0 %v2588_v21 }
 0x18a   :  { %v1505_v26 = vpop.xlane.xlu1 %1504 }
 0x18b   :  { %1822 = vmatmul.mubr.msk.bf16.gmra.mxu0 %vm342_vm1, %v336_v59  ;;  %v1500_v38 = vpop.xlane.xlu0 %1499  ;;  %v1508_v8 = vmul.f32 0.00390625, %v1505_v26 }
 0x18c   :  { %533 = vmatprep.mubr.bf16.mxu0 %v2588_v21  ;;  %v1507_v6 = vmul.f32 0.00390625, %v1500_v38 }
 0x18d   :  { %v1527_v29 = vrot.slane %v1508_v8, %v1522_v45 }
 0x18e   :  { %v1523_v23 = vrot.slane %v1507_v6, %v1522_v45 }
 0x190   :  { %v1529_v20 = vsel %vm1528_vm4, %v1527_v29, %v1523_v23  ;;  %v1013_v52 = vpop.trf.xlu1 }
 0x191   :  { %v997_v43 = vpop.trf.xlu0 }
 0x192   :  { %1861 = vmatmul.mubr.msk.bf16.vlgmr.msra.gmra.mxu1 %vm342_vm1, %v997_v43 }
 0x193   :  { %1823 = vmatmul.mubr.msk.bf16.gmra.mxu0 %vm342_vm1, %v337_v34  ;;  %2010 = vmatpush3.msra.mxu1 %v1614_v13 }
 0x194   :  { %543 = vmatprep.mubr.bf16.mxu0 %v2588_v21  ;;  %1111 = vmatprep.mubr.bf16.mxu1 %v2588_v21  ;;  %v1014_v40 = vpop.trf.xlu1 }
 0x195   :  { %2011 = vmatprep.subr.mxu1 %v2112_v32  ;;  %v998_v16 = vpop.trf.xlu0 }
 0x196   :  { %2012 = vmatpush3.msra.mxu1 %v1613_v44 }
 0x197   :  { %2013 = vmatprep.subr.mxu1 %v2112_v32 }
 0x198   :  { %2014 = vmatpush3.msra.mxu1 %v1612_v50  ;;  %v1015_v46 = vpop.trf.xlu1 }
 0x199   :  { %v999_v62 = vpop.trf.xlu0  ;;  %2015 = vmatprep.subr.mxu1 %v2112_v32 }
 0x19a   :  { %1862 = vmatmul.mubr.msk.bf16.gmra.mxu1 %vm342_vm1, %v998_v16 }
 0x19b   :  { %1824 = vmatmul.mubr.msk.bf16.gmra.mxu0 %vm342_vm1, %v338_v36  ;;  %1121 = vmatprep.mubr.bf16.mxu1 %v2588_v21 }
 0x19c   :  { %553 = vmatprep.mubr.bf16.mxu0 %v2588_v21  ;;  %2016 = vmatpush3.msra.mxu1 %v1611_v27  ;;  %v1016_v18 = vpop.trf.xlu1 }
 0x19d   :  { %v1000_v63 = vpop.trf.xlu0 }
 0x1a0   :  { %v1017_v51 = vpop.trf.xlu1 }
 0x1a1   :  { %v1001_v24 = vpop.trf.xlu0 }
 0x1a2   :  { %1863 = vmatmul.mubr.msk.bf16.gmra.mxu1 %vm342_vm1, %v999_v62 }
 0x1a3   :  { %1825 = vmatmul.mubr.msk.bf16.gmra.mxu0 %vm342_vm1, %v339_v39  ;;  %1131 = vmatprep.mubr.bf16.mxu1 %v2588_v21 }
 0x1a4   :  { %563 = vmatprep.mubr.bf16.mxu0 %v2588_v21  ;;  %v1018_v53 = vpop.trf.xlu1 }
 0x1a5   :  { %v1002_v14 = vpop.trf.xlu0 }
 0x1a8   :  { %v1019_v15 = vpop.trf.xlu1 }
 0x1a9   :  { %v1003_v33 = vpop.trf.xlu0 }
 0x1aa   :  { %1864 = vmatmul.mubr.msk.bf16.gmra.mxu1 %vm342_vm1, %v1000_v63 }
 0x1ab   :  { %1826 = vmatmul.mubr.msk.bf16.gmra.mxu0 %vm342_vm1, %v340_v35  ;;  %1141 = vmatprep.mubr.bf16.mxu1 %v2588_v21 }
 0x1ac   :  { %573 = vmatprep.mubr.bf16.mxu0 %v2588_v21  ;;  %v1020_v12 = vpop.trf.xlu1 }
 0x1ad   :  { %v1004_v55 = vpop.trf.xlu0 }
 0x1b2   :  { %1865 = vmatmul.mubr.msk.bf16.gmra.mxu1 %vm342_vm1, %v1001_v24 }
 0x1b3   :  { %1827 = vmatmul.mubr.msk.bf16.gmra.mxu0 %vm342_vm1, %v341_v37  ;;  %1151 = vmatprep.mubr.bf16.mxu1 %v2588_v21 }
 0x1b4   :  { %2006 = vmatprep.mubr.msk.f32.mxu0 %vm2113_vm3, %v2112_v32 }
 0x1ba   :  { %1866 = vmatmul.mubr.msk.bf16.gmra.mxu1 %vm342_vm1, %v1002_v14 }
 0x1bb   :  { %2007 = vmatmul.mubr.msk.f32.vlgmr.msra.gmra.mxu0 %vm1530_vm2, %v1529_v20  ;;  %1161 = vmatprep.mubr.bf16.mxu1 %v2588_v21 }
 0x1bc   :  { %2028 = vmatprep.mubr.msk.f32.mxu0 %vm2113_vm3, %v2112_v32 }
 0x1c2   :  { %1867 = vmatmul.mubr.msk.bf16.gmra.mxu1 %vm342_vm1, %v1003_v33 }
 0x1c3   :  { %1171 = vmatprep.mubr.bf16.mxu1 %v2588_v21 }
 0x1ca   :  { %1868 = vmatmul.mubr.msk.bf16.gmra.mxu1 %vm342_vm1, %v1004_v55 }
 0x1cb   :  { %1181 = vmatprep.mubr.bf16.mxu1 %v2588_v21 }
 0x1d2   :  { %1869 = vmatmul.mubr.msk.bf16.gmra.mxu1 %vm342_vm1, %v1013_v52 }
 0x1d3   :  { %1191 = vmatprep.mubr.bf16.mxu1 %v2588_v21 }
 0x1da   :  { %1870 = vmatmul.mubr.msk.bf16.gmra.mxu1 %vm342_vm1, %v1014_v40 }
 0x1db   :  { %1201 = vmatprep.mubr.bf16.mxu1 %v2588_v21 }
 0x1e2   :  { %1871 = vmatmul.mubr.msk.bf16.gmra.mxu1 %vm342_vm1, %v1015_v46 }
 0x1e3   :  { %1211 = vmatprep.mubr.bf16.mxu1 %v2588_v21 }
 0x1ea   :  { %1872 = vmatmul.mubr.msk.bf16.gmra.mxu1 %vm342_vm1, %v1016_v18 }
 0x1eb   :  { %1221 = vmatprep.mubr.bf16.mxu1 %v2588_v21 }
 0x1f2   :  { %1873 = vmatmul.mubr.msk.bf16.gmra.mxu1 %vm342_vm1, %v1017_v51 }
 0x1f3   :  { %1231 = vmatprep.mubr.bf16.mxu1 %v2588_v21 }
 0x1fa   :  { %1874 = vmatmul.mubr.msk.bf16.gmra.mxu1 %vm342_vm1, %v1018_v53 }
 0x1fb   :  { %v425_v41 = vpop.f32.mrf.mxu0  ;;  %1241 = vmatprep.mubr.bf16.mxu1 %v2588_v21 }
 0x1fd   :  { %v427_v19 = vpop.f32.mrf.mxu0 }
 0x1fe   :  { %v1919_v42 = vpack.c.bf16 %v427_v19, %v425_v41 }
 0x1ff   :  { %v429_v22 = vpop.f32.mrf.mxu0 }
 0x200   :  { %776 = vst [vmem:[#allocation4] sm:$0xff] %v1919_v42 }
 0x201   :  { %v431_v54 = vpop.f32.mrf.mxu0 }
 0x202   :  { %v1920_v9 = vpack.c.bf16 %v431_v54, %v429_v22  ;;  %1875 = vmatmul.mubr.msk.bf16.gmra.mxu1 %vm342_vm1, %v1019_v15 }
 0x203   :  { %v435_v61 = vpop.f32.mrf.mxu0  ;;  %1251 = vmatprep.mubr.bf16.mxu1 %v2588_v21 }
 0x204   :  { %777 = vst [vmem:[#allocation4 + $0x8] sm:$0xff] %v1920_v9 }
 0x205   :  { %v437_v47 = vpop.f32.mrf.mxu0 }
 0x206   :  { %v1921_v48 = vpack.c.bf16 %v437_v47, %v435_v61  ;;  %v1699_v61 = vld [vmem:[%s2566_s6 + $0x18] sm:$0xff] }
 0x207   :  { %v439_v49 = vpop.f32.mrf.mxu0  ;;  %2021 = vmatpush3.msra.mxu0 %v1699_v61 }
 0x208   :  { %778 = vst [vmem:[#allocation4 + $0x10] sm:$0xff] %v1921_v48  ;;  %2022 = vmatprep.subr.mxu0 %v2112_v32 }
 0x209   :  { %v441_v2 = vpop.f32.mrf.mxu0 }
 0x20a   :  { %v1922_v11 = vpack.c.bf16 %v441_v2, %v439_v49  ;;  %1876 = vmatmul.mubr.msk.bf16.gmra.mxu1 %vm342_vm1, %v1020_v12 }
 0x20b   :  { %v445_v1 = vpop.f32.mrf.mxu0  ;;  %2017 = vmatprep.mubr.msk.f32.mxu1 %vm2113_vm3, %v2112_v32 }
 0x20c   :  { %779 = vst [vmem:[#allocation4 + $0x18] sm:$0xff] %v1922_v11 }
 0x20d   :  { %v447_v28 = vpop.f32.mrf.mxu0 }
 0x20e   :  { %v1923_v30 = vpack.c.bf16 %v447_v28, %v445_v1 }
 0x20f   :  { %v449_v4 = vpop.f32.mrf.mxu0 }
 0x210   :  { %780 = vst [vmem:[#allocation4 + $0x20] sm:$0xff] %v1923_v30 }
 0x211   :  { %v451_v21 = vpop.f32.mrf.mxu0 }
 0x212   :  { %v1924_v0 = vpack.c.bf16 %v451_v21, %v449_v4 }
 0x213   :  { %v455_v7 = vpop.f32.mrf.mxu0 }
 0x214   :  { %781 = vst [vmem:[#allocation4 + $0x28] sm:$0xff] %v1924_v0 }
 0x215   :  { %v457_v60 = vpop.f32.mrf.mxu0 }
 0x216   :  { %v1925_v17 = vpack.c.bf16 %v457_v60, %v455_v7 }
 0x217   :  { %v459_v10 = vpop.f32.mrf.mxu0 }
 0x218   :  { %782 = vst [vmem:[#allocation4 + $0x30] sm:$0xff] %v1925_v17 }
 0x219   :  { %v461_v31 = vpop.f32.mrf.mxu0 }
 0x21a   :  { %v1926_v56 = vpack.c.bf16 %v461_v31, %v459_v10 }
 0x21b   :  { %v465_v57 = vpop.f32.mrf.mxu0 }
 0x21c   :  { %783 = vst [vmem:[#allocation4 + $0x38] sm:$0xff] %v1926_v56 }
 0x21d   :  { %v467_v58 = vpop.f32.mrf.mxu0 }
 0x21e   :  { %v1927_v59 = vpack.c.bf16 %v467_v58, %v465_v57 }
 0x21f   :  { %v469_v34 = vpop.f32.mrf.mxu0 }
 0x220   :  { %784 = vst [vmem:[#allocation4 + $0x40] sm:$0xff] %v1927_v59 }
 0x221   :  { %v471_v36 = vpop.f32.mrf.mxu0 }
 0x222   :  { %v1928_v39 = vpack.c.bf16 %v471_v36, %v469_v34 }
 0x223   :  { %v475_v35 = vpop.f32.mrf.mxu0 }
 0x224   :  { %785 = vst [vmem:[#allocation4 + $0x48] sm:$0xff] %v1928_v39 }
 0x225   :  { %v477_v37 = vpop.f32.mrf.mxu0 }
 0x226   :  { %v1929_v38 = vpack.c.bf16 %v477_v37, %v475_v35 }
 0x227   :  { %v479_v13 = vpop.f32.mrf.mxu0 }
 0x228   :  { %786 = vst [vmem:[#allocation4 + $0x50] sm:$0xff] %v1929_v38 }
 0x229   :  { %v481_v43 = vpop.f32.mrf.mxu0 }
 0x22a   :  { %v1930_v16 = vpack.c.bf16 %v481_v43, %v479_v13 }
 0x22b   :  { %v485_v62 = vpop.f32.mrf.mxu0 }
 0x22c   :  { %787 = vst [vmem:[#allocation4 + $0x58] sm:$0xff] %v1930_v16 }
 0x22d   :  { %v487_v44 = vpop.f32.mrf.mxu0 }
 0x22e   :  { %v1931_v63 = vpack.c.bf16 %v487_v44, %v485_v62 }
 0x22f   :  { %v489_v25 = vpop.f32.mrf.mxu0 }
 0x230   :  { %788 = vst [vmem:[#allocation4 + $0x60] sm:$0xff] %v1931_v63 }
 0x231   :  { %v491_v3 = vpop.f32.mrf.mxu0 }
 0x232   :  { %v1932_v26 = vpack.c.bf16 %v491_v3, %v489_v25 }
 0x233   :  { %v495_v24 = vpop.f32.mrf.mxu0 }
 0x234   :  { %789 = vst [vmem:[#allocation4 + $0x68] sm:$0xff] %v1932_v26 }
 0x235   :  { %v497_v5 = vpop.f32.mrf.mxu0 }
 0x236   :  { %v1933_v45 = vpack.c.bf16 %v497_v5, %v495_v24 }
 0x237   :  { %v499_v6 = vpop.f32.mrf.mxu0 }
 0x238   :  { %790 = vst [vmem:[#allocation4 + $0x70] sm:$0xff] %v1933_v45 }
 0x239   :  { %v501_v8 = vpop.f32.mrf.mxu0 }
 0x23a   :  { %v1934_v23 = vpack.c.bf16 %v501_v8, %v499_v6 }
 0x23b   :  { %v505_v29 = vpop.f32.mrf.mxu0 }
 0x23c   :  { %791 = vst [vmem:[#allocation4 + $0x78] sm:$0xff] %v1934_v23 }
 0x23d   :  { %v507_v14 = vpop.f32.mrf.mxu0 }
 0x23e   :  { %v1935_v20 = vpack.c.bf16 %v507_v14, %v505_v29 }
 0x23f   :  { %v509_v33 = vpop.f32.mrf.mxu0 }
 0x240   :  { %792 = vst [vmem:[#allocation4 + $0x80] sm:$0xff] %v1935_v20 }
 0x241   :  { %v511_v50 = vpop.f32.mrf.mxu0 }
 0x242   :  { %v1936_v55 = vpack.c.bf16 %v511_v50, %v509_v33 }
 0x243   :  { %v515_v52 = vpop.f32.mrf.mxu0 }
 0x244   :  { %793 = vst [vmem:[#allocation4 + $0x88] sm:$0xff] %v1936_v55 }
 0x245   :  { %v517_v40 = vpop.f32.mrf.mxu0 }
 0x246   :  { %v1937_v46 = vpack.c.bf16 %v517_v40, %v515_v52 }
 0x247   :  { %v519_v27 = vpop.f32.mrf.mxu0 }
 0x248   :  { %794 = vst [vmem:[#allocation4 + $0x90] sm:$0xff] %v1937_v46 }
 0x249   :  { %v521_v18 = vpop.f32.mrf.mxu0 }
 0x24a   :  { %v1938_v51 = vpack.c.bf16 %v521_v18, %v519_v27 }
 0x24b   :  { %v525_v53 = vpop.f32.mrf.mxu0 }
 0x24c   :  { %795 = vst [vmem:[#allocation4 + $0x98] sm:$0xff] %v1938_v51 }
 0x24d   :  { %v527_v41 = vpop.f32.mrf.mxu0 }
 0x24e   :  { %v1939_v19 = vpack.c.bf16 %v527_v41, %v525_v53 }
 0x24f   :  { %v529_v42 = vpop.f32.mrf.mxu0 }
 0x250   :  { %796 = vst [vmem:[#allocation4 + $0xa0] sm:$0xff] %v1939_v19  ;;  %v1909_v19 = vld [vmem:[%s2563_s3] ss:$0 sm:$0xff] }
 0x251   :  { %v531_v22 = vpop.f32.mrf.mxu0 }
 0x252   :  { %v1940_v15 = vpack.c.bf16 %v531_v22, %v529_v42  ;;  %v1103_v54 = vpop.f32.mrf.mxu1 }
 0x253   :  { %v535_v9 = vpop.f32.mrf.mxu0 }
 0x254   :  { %797 = vst [vmem:[#allocation4 + $0xa8] sm:$0xff] %v1940_v15  ;;  %v1105_v47 = vpop.f32.mrf.mxu1 }
 0x255   :  { %v537_v48 = vpop.f32.mrf.mxu0  ;;  %v1951_v49 = vpack.c.bf16 %v1105_v47, %v1103_v54 }
 0x256   :  { %v1941_v12 = vpack.c.bf16 %v537_v48, %v535_v9  ;;  %v1107_v2 = vpop.f32.mrf.mxu1 }
 0x257   :  { %v539_v11 = vpop.f32.mrf.mxu0  ;;  %1455 = vst [vmem:[#allocation4 + $0x100] sm:$0xff] %v1951_v49 }
 0x258   :  { %798 = vst [vmem:[#allocation4 + $0xb0] sm:$0xff] %v1941_v12  ;;  %v1109_v1 = vpop.f32.mrf.mxu1 }
 0x259   :  { %v541_v28 = vpop.f32.mrf.mxu0  ;;  %v1952_v30 = vpack.c.bf16 %v1109_v1, %v1107_v2 }
 0x25a   :  { %v1942_v4 = vpack.c.bf16 %v541_v28, %v539_v11  ;;  %v1113_v21 = vpop.f32.mrf.mxu1 }
 0x25b   :  { %v545_v0 = vpop.f32.mrf.mxu0  ;;  %1456 = vst [vmem:[#allocation4 + $0x108] sm:$0xff] %v1952_v30 }
 0x25c   :  { %799 = vst [vmem:[#allocation4 + $0xb8] sm:$0xff] %v1942_v4  ;;  %v1115_v7 = vpop.f32.mrf.mxu1 }
 0x25d   :  { %v547_v60 = vpop.f32.mrf.mxu0  ;;  %v1953_v17 = vpack.c.bf16 %v1115_v7, %v1113_v21 }
 0x25e   :  { %v1943_v10 = vpack.c.bf16 %v547_v60, %v545_v0  ;;  %v1117_v31 = vpop.f32.mrf.mxu1 }
 0x25f   :  { %v549_v56 = vpop.f32.mrf.mxu0  ;;  %1457 = vst [vmem:[#allocation4 + $0x110] sm:$0xff] %v1953_v17 }
 0x260   :  { %800 = vst [vmem:[#allocation4 + $0xc0] sm:$0xff] %v1943_v10  ;;  %v1119_v57 = vpop.f32.mrf.mxu1 }
 0x261   :  { %v551_v58 = vpop.f32.mrf.mxu0  ;;  %v1954_v59 = vpack.c.bf16 %v1119_v57, %v1117_v31 }
 0x262   :  { %v1944_v34 = vpack.c.bf16 %v551_v58, %v549_v56  ;;  %v1123_v36 = vpop.f32.mrf.mxu1 }
 0x263   :  { %v555_v39 = vpop.f32.mrf.mxu0  ;;  %1458 = vst [vmem:[#allocation4 + $0x118] sm:$0xff] %v1954_v59 }
 0x264   :  { %801 = vst [vmem:[#allocation4 + $0xc8] sm:$0xff] %v1944_v34  ;;  %v1125_v35 = vpop.f32.mrf.mxu1 }
 0x265   :  { %v557_v37 = vpop.f32.mrf.mxu0  ;;  %v1955_v38 = vpack.c.bf16 %v1125_v35, %v1123_v36 }
 0x266   :  { %v1945_v13 = vpack.c.bf16 %v557_v37, %v555_v39  ;;  %v1127_v43 = vpop.f32.mrf.mxu1 }
 0x267   :  { %v559_v16 = vpop.f32.mrf.mxu0  ;;  %1459 = vst [vmem:[#allocation4 + $0x120] sm:$0xff] %v1955_v38 }
 0x268   :  { %802 = vst [vmem:[#allocation4 + $0xd0] sm:$0xff] %v1945_v13  ;;  %v1129_v62 = vpop.f32.mrf.mxu1 }
 0x269   :  { %v561_v44 = vpop.f32.mrf.mxu0  ;;  %v1956_v63 = vpack.c.bf16 %v1129_v62, %v1127_v43 }
 0x26a   :  { %v1946_v25 = vpack.c.bf16 %v561_v44, %v559_v16  ;;  %v1133_v3 = vpop.f32.mrf.mxu1 }
 0x26b   :  { %v565_v26 = vpop.f32.mrf.mxu0  ;;  %1460 = vst [vmem:[#allocation4 + $0x128] sm:$0xff] %v1956_v63 }
 0x26c   :  { %803 = vst [vmem:[#allocation4 + $0xd8] sm:$0xff] %v1946_v25  ;;  %v1135_v24 = vpop.f32.mrf.mxu1 }
 0x26d   :  { %v567_v5 = vpop.f32.mrf.mxu0  ;;  %v1957_v45 = vpack.c.bf16 %v1135_v24, %v1133_v3 }
 0x26e   :  { %v1947_v6 = vpack.c.bf16 %v567_v5, %v565_v26  ;;  %v1137_v8 = vpop.f32.mrf.mxu1 }
 0x26f   :  { %v569_v23 = vpop.f32.mrf.mxu0  ;;  %1461 = vst [vmem:[#allocation4 + $0x130] sm:$0xff] %v1957_v45 }
 0x270   :  { %804 = vst [vmem:[#allocation4 + $0xe0] sm:$0xff] %v1947_v6  ;;  %v1139_v29 = vpop.f32.mrf.mxu1 }
 0x271   :  { %v571_v14 = vpop.f32.mrf.mxu0  ;;  %v1958_v20 = vpack.c.bf16 %v1139_v29, %v1137_v8 }
 0x272   :  { %v1948_v33 = vpack.c.bf16 %v571_v14, %v569_v23  ;;  %v1143_v50 = vpop.f32.mrf.mxu1 }
 0x273   :  { %v575_v55 = vpop.f32.mrf.mxu0  ;;  %1462 = vst [vmem:[#allocation4 + $0x138] sm:$0xff] %v1958_v20 }
 0x274   :  { %805 = vst [vmem:[#allocation4 + $0xe8] sm:$0xff] %v1948_v33  ;;  %v1145_v52 = vpop.f32.mrf.mxu1 }
 0x275   :  { %v577_v40 = vpop.f32.mrf.mxu0  ;;  %v1959_v46 = vpack.c.bf16 %v1145_v52, %v1143_v50 }
 0x276   :  { %v1949_v27 = vpack.c.bf16 %v577_v40, %v575_v55  ;;  %v1147_v18 = vpop.f32.mrf.mxu1 }
 0x277   :  { %v579_v51 = vpop.f32.mrf.mxu0  ;;  %1463 = vst [vmem:[#allocation4 + $0x140] sm:$0xff] %v1959_v46 }
 0x278   :  { %806 = vst [vmem:[#allocation4 + $0xf0] sm:$0xff] %v1949_v27  ;;  %v1149_v53 = vpop.f32.mrf.mxu1 }
 0x279   :  { %v581_v41 = vpop.f32.mrf.mxu0  ;;  %v1960_v42 = vpack.c.bf16 %v1149_v53, %v1147_v18  ;;  %v1697_v53 = vld [vmem:[%s2566_s6 + $0x8] sm:$0xff] }
 0x27a   :  { %v1950_v22 = vpack.c.bf16 %v581_v41, %v579_v51  ;;  %v1153_v15 = vpop.f32.mrf.mxu1  ;;  %v1698_v51 = vld [vmem:[%s2566_s6 + $0x10] sm:$0xff] }
 0x27b   :  { %v1607_v54 = vpop.f32.mrf.mxu0  ;;  %1464 = vst [vmem:[#allocation4 + $0x148] sm:$0xff] %v1960_v42  ;;  %2023 = vmatpush3.msra.mxu0 %v1698_v51 }
 0x27c   :  { %807 = vst [vmem:[#allocation4 + $0xf8] sm:$0xff] %v1950_v22  ;;  %v1608_v9 = vadd.f32 %v1909_v19, %v1607_v54  ;;  %v1155_v61 = vpop.f32.mrf.mxu1  ;;  %2024 = vmatprep.subr.mxu0 %v2112_v32  ;;  %v1696_v19 = vld [vmem:[%s2566_s6] sm:$0xff] }
 0x27d   :  { %v2008_v47 = vpop.f32.mrf.mxu0  ;;  %v1961_v48 = vpack.c.bf16 %v1155_v61, %v1153_v15  ;;  %2025 = vmatpush3.msra.mxu0 %v1697_v53 }
 0x27e   :  { %2018 = vmatmul.mubr.msk.f32.vlgmr.msra.gmra.mxu1 %vm342_vm1, %v1608_v9  ;;  %v1157_v49 = vpop.f32.mrf.mxu1  ;;  %2026 = vmatprep.subr.mxu0 %v2112_v32 }
 0x27f   :  { %1465 = vst [vmem:[#allocation4 + $0x150] sm:$0xff] %v1961_v48  ;;  %2027 = vmatpush3.msra.mxu0 %v1696_v19 }
 0x280   :  { %v1159_v12 = vpop.f32.mrf.mxu1 }
 0x281   :  { %v1962_v2 = vpack.c.bf16 %v1159_v12, %v1157_v49 }
 0x282   :  { %v1163_v11 = vpop.f32.mrf.mxu1 }
 0x283   :  { %1466 = vst [vmem:[#allocation4 + $0x158] sm:$0xff] %v1962_v2 }
 0x284   :  { %v1165_v1 = vpop.f32.mrf.mxu1 }
 0x285   :  { %v1963_v28 = vpack.c.bf16 %v1165_v1, %v1163_v11  ;;  %v1915_v11 = vld [vmem:[%s2565_s5] ss:$0 sm:$0xff] }
 0x286   :  { %v1167_v30 = vpop.f32.mrf.mxu1 }
 0x287   :  { %1467 = vst [vmem:[#allocation4 + $0x160] sm:$0xff] %v1963_v28 }
 0x288   :  { %v1169_v4 = vpop.f32.mrf.mxu1 }
 0x289   :  { %v1964_v21 = vpack.c.bf16 %v1169_v4, %v1167_v30 }
 0x28a   :  { %v1173_v0 = vpop.f32.mrf.mxu1 }
 0x28b   :  { %1468 = vst [vmem:[#allocation4 + $0x168] sm:$0xff] %v1964_v21 }
 0x28c   :  { %v1175_v7 = vpop.f32.mrf.mxu1 }
 0x28d   :  { %v1965_v60 = vpack.c.bf16 %v1175_v7, %v1173_v0 }
 0x28e   :  { %v1177_v17 = vpop.f32.mrf.mxu1 }
 0x28f   :  { %1469 = vst [vmem:[#allocation4 + $0x170] sm:$0xff] %v1965_v60 }
 0x290   :  { %v1179_v10 = vpop.f32.mrf.mxu1 }
 0x291   :  { %v1966_v31 = vpack.c.bf16 %v1179_v10, %v1177_v17 }
 0x292   :  { %v1183_v56 = vpop.f32.mrf.mxu1 }
 0x293   :  { %1470 = vst [vmem:[#allocation4 + $0x178] sm:$0xff] %v1966_v31 }
 0x294   :  { %v1185_v57 = vpop.f32.mrf.mxu1 }
 0x295   :  { %v1967_v58 = vpack.c.bf16 %v1185_v57, %v1183_v56 }
 0x296   :  { %v1187_v59 = vpop.f32.mrf.mxu1 }
 0x297   :  { %1471 = vst [vmem:[#allocation4 + $0x180] sm:$0xff] %v1967_v58 }
 0x298   :  { %v1189_v34 = vpop.f32.mrf.mxu1 }
 0x299   :  { %v1968_v36 = vpack.c.bf16 %v1189_v34, %v1187_v59 }
 0x29a   :  { %v1193_v39 = vpop.f32.mrf.mxu1 }
 0x29b   :  { %1472 = vst [vmem:[#allocation4 + $0x188] sm:$0xff] %v1968_v36 }
 0x29c   :  { %v1195_v35 = vpop.f32.mrf.mxu1 }
 0x29d   :  { %v1969_v37 = vpack.c.bf16 %v1195_v35, %v1193_v39 }
 0x29e   :  { %v1197_v38 = vpop.f32.mrf.mxu1 }
 0x29f   :  { %1473 = vst [vmem:[#allocation4 + $0x190] sm:$0xff] %v1969_v37 }
 0x2a0   :  { %v1199_v13 = vpop.f32.mrf.mxu1 }
 0x2a1   :  { %v1970_v43 = vpack.c.bf16 %v1199_v13, %v1197_v38 }
 0x2a2   :  { %v1203_v16 = vpop.f32.mrf.mxu1 }
 0x2a3   :  { %1474 = vst [vmem:[#allocation4 + $0x198] sm:$0xff] %v1970_v43 }
 0x2a4   :  { %v1205_v62 = vpop.f32.mrf.mxu1 }
 0x2a5   :  { %v1971_v44 = vpack.c.bf16 %v1205_v62, %v1203_v16 }
 0x2a6   :  { %v1207_v63 = vpop.f32.mrf.mxu1 }
 0x2a7   :  { %1475 = vst [vmem:[#allocation4 + $0x1a0] sm:$0xff] %v1971_v44 }
 0x2a8   :  { %v1209_v25 = vpop.f32.mrf.mxu1 }
 0x2a9   :  { %v1972_v3 = vpack.c.bf16 %v1209_v25, %v1207_v63 }
 0x2aa   :  { %v1213_v26 = vpop.f32.mrf.mxu1 }
 0x2ab   :  { %1476 = vst [vmem:[#allocation4 + $0x1a8] sm:$0xff] %v1972_v3 }
 0x2ac   :  { %v1215_v24 = vpop.f32.mrf.mxu1 }
 0x2ad   :  { %v1973_v5 = vpack.c.bf16 %v1215_v24, %v1213_v26 }
 0x2ae   :  { %v1217_v45 = vpop.f32.mrf.mxu1 }
 0x2af   :  { %1477 = vst [vmem:[#allocation4 + $0x1b0] sm:$0xff] %v1973_v5 }
 0x2b0   :  { %v1219_v6 = vpop.f32.mrf.mxu1 }
 0x2b1   :  { %v1974_v8 = vpack.c.bf16 %v1219_v6, %v1217_v45 }
 0x2b2   :  { %v1223_v23 = vpop.f32.mrf.mxu1 }
 0x2b3   :  { %1478 = vst [vmem:[#allocation4 + $0x1b8] sm:$0xff] %v1974_v8 }
 0x2b4   :  { %v1225_v29 = vpop.f32.mrf.mxu1 }
 0x2b5   :  { %v1975_v14 = vpack.c.bf16 %v1225_v29, %v1223_v23 }
 0x2b6   :  { %v1227_v20 = vpop.f32.mrf.mxu1 }
 0x2b7   :  { %1479 = vst [vmem:[#allocation4 + $0x1c0] sm:$0xff] %v1975_v14 }
 0x2b8   :  { %v1229_v33 = vpop.f32.mrf.mxu1 }
 0x2b9   :  { %v1976_v50 = vpack.c.bf16 %v1229_v33, %v1227_v20 }
 0x2ba   :  { %v1233_v55 = vpop.f32.mrf.mxu1 }
 0x2bb   :  { %1480 = vst [vmem:[#allocation4 + $0x1c8] sm:$0xff] %v1976_v50 }
 0x2bc   :  { %v1235_v52 = vpop.f32.mrf.mxu1 }
 0x2bd   :  { %v1977_v40 = vpack.c.bf16 %v1235_v52, %v1233_v55 }
 0x2be   :  { %v1237_v46 = vpop.f32.mrf.mxu1 }
 0x2bf   :  { %1481 = vst [vmem:[#allocation4 + $0x1d0] sm:$0xff] %v1977_v40 }
 0x2c0   :  { %v1239_v27 = vpop.f32.mrf.mxu1 }
 0x2c1   :  { %v1978_v18 = vpack.c.bf16 %v1239_v27, %v1237_v46 }
 0x2c2   :  { %v1243_v41 = vpop.f32.mrf.mxu1 }
 0x2c3   :  { %1482 = vst [vmem:[#allocation4 + $0x1d8] sm:$0xff] %v1978_v18 }
 0x2c4   :  { %v1245_v42 = vpop.f32.mrf.mxu1 }
 0x2c5   :  { %v1979_v22 = vpack.c.bf16 %v1245_v42, %v1243_v41 }
 0x2c6   :  { %v1247_v15 = vpop.f32.mrf.mxu1 }
 0x2c7   :  { %1483 = vst [vmem:[#allocation4 + $0x1e0] sm:$0xff] %v1979_v22 }
 0x2c8   :  { %v1249_v54 = vpop.f32.mrf.mxu1 }
 0x2c9   :  { %v1980_v9 = vpack.c.bf16 %v1249_v54, %v1247_v15 }
 0x2ca   :  { %v1253_v61 = vpop.f32.mrf.mxu1 }
 0x2cb   :  { %1484 = vst [vmem:[#allocation4 + $0x1e8] sm:$0xff] %v1980_v9 }
 0x2cc   :  { %v1255_v47 = vpop.f32.mrf.mxu1 }
 0x2cd   :  { %v1981_v48 = vpack.c.bf16 %v1255_v47, %v1253_v61 }
 0x2ce   :  { %v1257_v49 = vpop.f32.mrf.mxu1 }
 0x2cf   :  { %1485 = vst [vmem:[#allocation4 + $0x1f0] sm:$0xff] %v1981_v48 }
 0x2d0   :  { %v1259_v12 = vpop.f32.mrf.mxu1 }
 0x2d1   :  { %v1982_v2 = vpack.c.bf16 %v1259_v12, %v1257_v49 }
 0x2d3   :  { %1486 = vst [vmem:[#allocation4 + $0x1f8] sm:$0xff] %v1982_v2 }
 0x33e   :  { %v1691_v1 = vpop.f32.mrf.mxu1 }
 0x33f   :  { %v1692_v32 = vadd.f32 %v1915_v11, %v1691_v1 }
 0x340   :  { %v2019_v28 = vpop.f32.mrf.mxu1 }
 0x341   :  { %v1695_v30 = vmax.f32 %v1692_v32, 0.0 }
 0x343   :  { %2029 = vmatmul.mubr.msk.f32.vlgmr.msra.gmra.mxu0 %vm342_vm1, %v1695_v30 }
 0x344   :  { %2075 = shalt.err (!%p2072_p4)
}
 0x345   :  { %s2115_s2 = smov 128   ;;  %s2116_s24 = smov 8   ;;  %v1917_v4 = vld [vmem:[%s2567_s7] ss:$0 sm:$0xff]  ;;  %vm1780_vm5 = vcmask 123904  }
 0x346   :  { %1803 = dma.vmem_to_hbm [thread:$0]  %s1798_s1, 8192, %s2569_s9, [#allocation5], %s2115_s2, %s2115_s2, %s2116_s24  }
 0x347   :  { %s2117_s27 = smov [#allocation2]  }
 0x348   :  { %s1788_s28 = sshll.u32 %s2117_s27, 4  ;;  %s1789_s28 = int_to_ptr.vmem [resolvable:$true] %s1788_s28 }
 0x349   :  { %s2084_s29 = scalar_lea.vmem %s1789_s28, 32  ;;  %p2089_p6 = scmp.lt.s32.totalorder %s1789_s28, %s1789_s28 }
 0x34a   :  { %p2085_p5 = scmp.ne.s32.totalorder %s1789_s28, %s2084_s29  ;;  %p2090_p7 = scmp.lt.s32.totalorder %s2084_s29, %s2084_s29 }
 0x34c   :  { %p2091_p8 = por %p2090_p7, %p2089_p6 }
 0x34e   :  { %p2092_p9 = pnand %p2091_p8, %p2085_p5 }
 0x403   :  { %v1776_v21 = vpop.f32.mrf.mxu0 }
 0x404   :  { %v1777_v0 = vadd.f32 %v1917_v4, %v1776_v21 }
 0x405   :  { %v2030_v7 = vpop.f32.mrf.mxu0 }
 0x406   :  { %1781 = vst.msk [vmem:[#allocation2] sm:$0x3] %vm1780_vm5, %v1777_v0 }
 0x407   :  { %2095 = shalt.err (!%p2092_p9)
}
 0x408   :  { %1791 = dma.vmem_to_hbm [thread:$0]  %s1789_s28, 32, %s2568_s8, [#allocation3]  }
 0x409   :  { %2104 = dma.done.wait [#allocation3], 32  }
 0x40a   :  { %2105 = vsyncadd [#allocation3], 4294967264 }
 0x40b   :  { %2106 = dma.done.wait [#allocation5], 8192  }
 0x40c   :  { %2107 = vsyncadd [#allocation5], 4294959104 }
 0x40d   :  { %1810 = vsyncpa [#allocation3], 1 }
 0x40e   :  { %1811 = vsyncpa [#allocation5], 1 }

</bundles_post_ra>
